<compile_context>
chip_gen: v7x
topology: tpu7x:2x2x1
jax: 0.10.0
libtpu: 0.0.40
codegen_flags: <defaults>
</compile_context>

<pallas_src>
import functools

import jax
import jax.numpy as jnp
from jax.experimental import pallas as pl
from jax.experimental.pallas import tpu as pltpu


# ---------------------------------------------------------------------------
# Fused FC_Block kernel (one row-slab of one batch element per grid step)
# ---------------------------------------------------------------------------
def _fc_block_kernel(x_mid_ref, x_top_ref, x_bot_ref, w_sp_ref, b_sp_ref,
                     w1_ref, b1_ref, w2_ref, b2_ref, o_ref, xpad_ref,
                     *, k, th, W, pad):
    """out = x + s + W2 @ GELU(W1 @ s + b1) + b2,  s = dwconv_kxk(x) + b_sp.

    x_mid_ref : (1, th, W, C)   current row slab of x (also the residual input)
    x_top_ref : (1, pad, W, C)  rows just above the slab (clamped at the border)
    x_bot_ref : (1, pad, W, C)  rows just below the slab (clamped at the border)
    w_sp_ref  : (k*k, C)        folded per-channel depthwise taps (all BNs in)
    b_sp_ref  : (1, C)          folded spatial bias
    w1_ref    : (C, hidden) bf16, b1_ref: (1, hidden)
    w2_ref    : (hidden, C) bf16, b2_ref: (1, C)
    o_ref     : (1, th, W, C)
    xpad_ref  : (th+2*pad, W+2*pad, C) f32 VMEM scratch (halo-padded slab)
    """
    c = x_mid_ref.shape[-1]
    i = pl.program_id(1)
    n_slabs = pl.num_programs(1)

    # --- assemble the halo-padded slab in VMEM scratch (no host-side pad) ----
    top = x_top_ref[0] * (i > 0).astype(jnp.float32)            # zero at top edge
    bot = x_bot_ref[0] * (i < n_slabs - 1).astype(jnp.float32)  # zero at bottom
    zero_col = jnp.zeros((th + 2 * pad, pad, c), jnp.float32)
    xpad_ref[:, 0:pad, :] = zero_col                            # left padding
    xpad_ref[:, pad + W:pad + W + pad, :] = zero_col            # right padding
    xpad_ref[0:pad, pad:pad + W, :] = top
    xpad_ref[pad:pad + th, pad:pad + W, :] = x_mid_ref[0]
    xpad_ref[pad + th:th + 2 * pad, pad:pad + W, :] = bot

    # --- fused spatial module: folded k x k depthwise conv + bias (VPU MACs) -
    # Hoist the k column-shifted views once; reuse them across the k row taps.
    cols = [xpad_ref[:, dx:dx + W, :] for dx in range(k)]       # (th+2p, W, C)
    w_all = w_sp_ref[...]                                       # (k*k, C)
    acc = jnp.zeros((th, W, c), jnp.float32)
    for dy in range(k):
        for dx in range(k):
            tap = w_all[dy * k + dx].reshape(1, 1, c)
            acc = acc + cols[dx][dy:dy + th] * tap
    s_slab = acc + b_sp_ref[...].reshape(1, 1, c)               # (th, W, C)

    # --- fused channel MLP + both residuals (MXU bf16 in / f32 acc) ----------
    m = th * W
    s2 = s_slab.reshape(m, c)
    h = jnp.dot(s2.astype(jnp.bfloat16), w1_ref[...],
                preferred_element_type=jnp.float32)             # (m, hidden)
    # TODO(synk): PyTorch nn.GELU() is exact (erf); tanh approximation is used
    # here for robust TPU lowering (max abs deviation ~3e-3).
    h = jax.nn.gelu(h + b1_ref[...], approximate=True)
    z = jnp.dot(h.astype(jnp.bfloat16), w2_ref[...],
                preferred_element_type=jnp.float32) + b2_ref[...]   # (m, C)
    out = x_mid_ref[0] + s_slab + z.reshape(th, W, c)
    o_ref[0] = out.astype(o_ref.dtype)


# ---------------------------------------------------------------------------
# Wrapper: slab selection + pallas_call
# ---------------------------------------------------------------------------
def _pick_slab_rows(H, W, C, hidden, pad):
    """Rows per slab: multiple of `pad` (halo-block granularity), divides H.
    Prefers >=2 slabs (pipelining / megacore) and an MXU-friendly M = th*W,
    subject to a conservative per-step VMEM estimate (v7x-safe budget)."""
    cands = [t for t in range(pad, H + 1, pad) if H % t == 0]

    def vmem_bytes(t):
        m = t * W
        act = 4 * (2 * t * W * C                          # x slab in + out slab
                   + (t + 2 * pad) * (W + 2 * pad) * C    # padded scratch
                   + m * hidden                           # hidden activation
                   + 2 * m * C)                           # s / z temporaries
        wgt = 2 * (C * hidden + hidden * C) + 4 * (hidden + 11 * C)
        return 2 * act + 2 * wgt                          # double-buffer headroom

    budget = 24 * 1024 * 1024
    ok = [t for t in cands if vmem_bytes(t) <= budget] or [cands[0]]
    multi = [t for t in ok if H // t >= 2] or ok
    for t in sorted(multi):
        if t * W >= 256:                                  # feed the 256-wide MXU
            return t
    return max(multi)


def fc_block_forward_nhwc(x, params):
    """Fused FC_Block forward on NHWC activations (no pads / no transposes)."""
    x = x.astype(jnp.float32)
    n, H, W, c = x.shape
    k = params["k"]
    pad = k // 2
    hidden = params["W1"].shape[1]
    assert k % 2 == 1 and k >= 3
    assert H % pad == 0, "H must be a multiple of k//2 for halo blocking"

    th = _pick_slab_rows(H, W, c, hidden, pad)
    n_slabs = H // th
    rb = th // pad                     # pad-sized halo blocks per slab

    kern = functools.partial(_fc_block_kernel, k=k, th=th, W=W, pad=pad)
    return pl.pallas_call(
        kern,
        out_shape=jax.ShapeDtypeStruct((n, H, W, c), jnp.float32),
        grid=(n, n_slabs),
        in_specs=[
            # current row slab of x (also the residual input)
            pl.BlockSpec((1, th, W, c), lambda b, i: (b, i, 0, 0)),
            # `pad` halo rows above / below (clamped at borders, zeroed in-kernel)
            pl.BlockSpec((1, pad, W, c),
                         lambda b, i: (b, jnp.maximum(i * rb - 1, 0), 0, 0)),
            pl.BlockSpec((1, pad, W, c),
                         lambda b, i: (b, jnp.minimum((i + 1) * rb,
                                                      H // pad - 1), 0, 0)),
            # folded weights (constant block index -> fetched once)
            pl.BlockSpec((k * k, c), lambda b, i: (0, 0)),
            pl.BlockSpec((1, c), lambda b, i: (0, 0)),
            pl.BlockSpec((c, hidden), lambda b, i: (0, 0)),
            pl.BlockSpec((1, hidden), lambda b, i: (0, 0)),
            pl.BlockSpec((hidden, c), lambda b, i: (0, 0)),
            pl.BlockSpec((1, c), lambda b, i: (0, 0)),
        ],
        out_specs=pl.BlockSpec((1, th, W, c), lambda b, i: (b, i, 0, 0)),
        scratch_shapes=[pltpu.VMEM((th + 2 * pad, W + 2 * pad, c), jnp.float32)],
        compiler_params=pltpu.CompilerParams(
            dimension_semantics=("parallel", "parallel"),
            vmem_limit_bytes=32 * 1024 * 1024),
    )(x, x, x, params["w_sp"], params["b_sp"],
      params["W1"], params["b1"], params["W2"], params["b2"])


def fc_block_forward(x_nchw, params):
    """PyTorch-layout (NCHW) adapter.  In an NHWC model call
    fc_block_forward_nhwc directly and skip both transposes."""
    x = jnp.transpose(x_nchw, (0, 2, 3, 1))
    out = fc_block_forward_nhwc(x, params)
    return jnp.transpose(out, (0, 3, 1, 2))


# ---------------------------------------------------------------------------
# Deterministic parameter construction + host-side BN folding
# ---------------------------------------------------------------------------
_BN_EPS = 1e-5  # nn.BatchNorm2d default


def _fold_bn(gamma, beta, mean, var, eps=_BN_EPS):
    scale = gamma / jnp.sqrt(var + eps)
    bias = beta - mean * scale
    return scale, bias


def _rand_bn(key, c):
    k1, k2, k3, k4 = jax.random.split(key, 4)
    gamma = 1.0 + 0.1 * jax.random.normal(k1, (c,))
    beta = 0.1 * jax.random.normal(k2, (c,))
    mean = 0.1 * jax.random.normal(k3, (c,))
    var = 1.0 + 0.1 * jnp.abs(jax.random.normal(k4, (c,)))
    return gamma, beta, mean, var


def make_fc_block_params(key, c, hidden, k):
    """Random (deterministic) FC_Block weights; folds all eval-mode BatchNorms
    and the 3-branch `spatial` sum into kernel-ready form (like .fuse())."""
    assert k >= 3 and k % 2 == 1, "spatial kernel size must be odd and >= 3"
    keys = jax.random.split(key, 12)

    # --- raw torch-layout weights -----------------------------------------
    wk = 0.1 * jax.random.normal(keys[0], (c, k, k))        # dw conv k x k
    bn_k = _rand_bn(keys[1], c)
    w1 = 0.1 * jax.random.normal(keys[2], (c,))             # dw 1x1 conv weight
    b1c = 0.1 * jax.random.normal(keys[3], (c,))            # dw 1x1 conv bias
    w3 = 0.1 * jax.random.normal(keys[4], (c, 3, 3))        # dw conv 3x3
    bn_3 = _rand_bn(keys[5], c)
    bn_out = _rand_bn(keys[6], c)                           # spatial outer BN

    wc1 = (2.0 / c) ** 0.5 * jax.random.normal(keys[7], (hidden, c))
    bn_1 = _rand_bn(keys[8], hidden)
    wc2 = (2.0 / hidden) ** 0.5 * jax.random.normal(keys[9], (c, hidden))
    bn_2 = _rand_bn(keys[10], c)

    # --- fold the spatial module into a single depthwise k x k conv -------
    sk, bk = _fold_bn(*bn_k)
    s3, b3 = _fold_bn(*bn_3)
    so, bo = _fold_bn(*bn_out)
    off = (k - 3) // 2
    ctr = k // 2
    w_comb = sk[:, None, None] * wk
    w_comb = w_comb.at[:, off:off + 3, off:off + 3].add(s3[:, None, None] * w3)
    w_comb = w_comb.at[:, ctr, ctr].add(w1 + 1.0)            # dw 1x1 + identity
    b_comb = bk + b1c + b3
    w_final = so[:, None, None] * w_comb                     # outer BN folded in
    b_final = so * b_comb + bo

    w_sp = w_final.reshape(c, k * k).T.astype(jnp.float32)   # (k*k, C)
    b_sp = b_final.reshape(1, c).astype(jnp.float32)

    # --- fold the channel MLP BNs into the 1x1 conv weights ---------------
    c1s, c1b = _fold_bn(*bn_1)
    c2s, c2b = _fold_bn(*bn_2)
    W1 = (wc1 * c1s[:, None]).T.astype(jnp.bfloat16)         # (C, hidden) bf16
    b1 = c1b.reshape(1, hidden).astype(jnp.float32)
    W2 = (wc2 * c2s[:, None]).T.astype(jnp.bfloat16)         # (hidden, C) bf16
    b2 = c2b.reshape(1, c).astype(jnp.float32)

    return {"k": k, "w_sp": w_sp, "b_sp": b_sp,
            "W1": W1, "b1": b1, "W2": W2, "b2": b2}


# ---------------------------------------------------------------------------
# Plain-JAX reference (all f32, same folded params / same GELU approx)
# ---------------------------------------------------------------------------
def _reference(x_nchw, params):
    x = jnp.transpose(x_nchw, (0, 2, 3, 1)).astype(jnp.float32)
    n, h, w, c = x.shape
    k = params["k"]
    pad = k // 2
    xp = jnp.pad(x, ((0, 0), (pad, pad), (pad, pad), (0, 0)))
    wsp = params["w_sp"]
    s = sum(xp[:, dy:dy + h, dx:dx + w, :] * wsp[dy * k + dx]
            for dy in range(k) for dx in range(k)) + params["b_sp"][0]
    hid = jax.nn.gelu(s @ params["W1"].astype(jnp.float32) + params["b1"][0],
                      approximate=True)
    z = hid @ params["W2"].astype(jnp.float32) + params["b2"][0]
    out = x + s + z
    return jnp.transpose(out, (0, 3, 1, 2))


# TODO(synk): DropPath(0.1) / Residual drop>0 training-mode stochastic depth is
# not implemented (forward here is eval-mode identity, matching model.eval()).

if __name__ == "__main__":
    key = jax.random.PRNGKey(0)
    k_params, k_input = jax.random.split(key)

    N, C, H, W = 2, 128, 16, 16     # inp == oup (required by the Residual add)
    HIDDEN, KSIZE = 256, 3
    params = make_fc_block_params(k_params, C, HIDDEN, KSIZE)
    x = jax.random.normal(k_input, (N, C, H, W), dtype=jnp.float32)  # NCHW

    fwd = jax.jit(lambda inp: fc_block_forward(inp, params))
    out = jax.block_until_ready(fwd(x))

    assert out.shape == (N, C, H, W), out.shape
    assert bool(jnp.isfinite(out).all())

    ref = _reference(x, params)
    max_err = float(jnp.max(jnp.abs(out - ref)))
    # Activations are rounded to bf16 before the MXU matmuls (f32 accumulation);
    # the reference keeps them f32 -> small intentional precision gap.
    assert max_err < 5e-2, f"mismatch vs reference: {max_err}"

    print("KERNEL_OK")
</pallas_src>

<mosaic_0001>
module attributes {stable_mosaic.version = 11 : i64} {
  func.func @_fc_block_kernel(%arg0: i32, %arg1: i32, %arg2: memref<1x8x16x128xf32, #tpu.memory_space<vmem>>, %arg3: memref<1x1x16x128xf32, #tpu.memory_space<vmem>>, %arg4: memref<1x1x16x128xf32, #tpu.memory_space<vmem>>, %arg5: memref<9x128xf32, #tpu.memory_space<vmem>>, %arg6: memref<1x128xf32, #tpu.memory_space<vmem>>, %arg7: memref<128x256xbf16, #tpu.memory_space<vmem>>, %arg8: memref<1x256xf32, #tpu.memory_space<vmem>>, %arg9: memref<256x128xbf16, #tpu.memory_space<vmem>>, %arg10: memref<1x128xf32, #tpu.memory_space<vmem>>, %arg11: memref<1x8x16x128xf32, #tpu.memory_space<vmem>>, %arg12: memref<10x18x128xf32, #tpu.memory_space<vmem>>) attributes {dimension_semantics = [#tpu.dimension_semantics<parallel>, #tpu.dimension_semantics<parallel>], iteration_bounds = array<i64: 2, 2>, scalar_prefetch = 0 : i64, scratch_operands = 1 : i64, tpu.core_type = #tpu.core_type<tc>, window_params = [{transform_indices = @transform_0, window_bounds = array<i64: 1, 8, 16, 128>}, {transform_indices = @transform_1, window_bounds = array<i64: 1, 1, 16, 128>}, {transform_indices = @transform_2, window_bounds = array<i64: 1, 1, 16, 128>}, {pipeline_mode = #tpu.pipeline_mode<synchronous>, transform_indices = @transform_3, window_bounds = array<i64: 9, 128>}, {pipeline_mode = #tpu.pipeline_mode<synchronous>, transform_indices = @transform_4, window_bounds = array<i64: 1, 128>}, {pipeline_mode = #tpu.pipeline_mode<synchronous>, transform_indices = @transform_5, window_bounds = array<i64: 128, 256>}, {pipeline_mode = #tpu.pipeline_mode<synchronous>, transform_indices = @transform_6, window_bounds = array<i64: 1, 256>}, {pipeline_mode = #tpu.pipeline_mode<synchronous>, transform_indices = @transform_7, window_bounds = array<i64: 256, 128>}, {pipeline_mode = #tpu.pipeline_mode<synchronous>, transform_indices = @transform_8, window_bounds = array<i64: 1, 128>}, {transform_indices = @transform_9, window_bounds = array<i64: 1, 8, 16, 128>}]} {
    %c0 = arith.constant 0 : index
    %c0_0 = arith.constant 0 : index
    %c0_1 = arith.constant 0 : index
    %c0_2 = arith.constant 0 : index
    %0 = vector.load %arg3[%c0, %c0_0, %c0_1, %c0_2] : memref<1x1x16x128xf32, #tpu.memory_space<vmem>>, vector<1x1x16x128xf32>
    %1 = vector.shape_cast %0 : vector<1x1x16x128xf32> to vector<1x16x128xf32>
    %c0_i32 = arith.constant 0 : i32
    %2 = arith.cmpi sgt, %arg1, %c0_i32 : i32
    %3 = arith.extui %2 : i1 to i32
    %4 = arith.sitofp %3 : i32 to f32
    %5 = vector.broadcast %4 : f32 to vector<1x16x128xf32>
    %6 = arith.mulf %1, %5 : vector<1x16x128xf32>
    %c0_3 = arith.constant 0 : index
    %c0_4 = arith.constant 0 : index
    %c0_5 = arith.constant 0 : index
    %c0_6 = arith.constant 0 : index
    %7 = vector.load %arg4[%c0_3, %c0_4, %c0_5, %c0_6] : memref<1x1x16x128xf32, #tpu.memory_space<vmem>>, vector<1x1x16x128xf32>
    %8 = vector.shape_cast %7 : vector<1x1x16x128xf32> to vector<1x16x128xf32>
    %c1_i32 = arith.constant 1 : i32
    %9 = arith.cmpi slt, %arg1, %c1_i32 : i32
    %10 = arith.extui %9 : i1 to i32
    %11 = arith.sitofp %10 : i32 to f32
    %12 = vector.broadcast %11 : f32 to vector<1x16x128xf32>
    %13 = arith.mulf %8, %12 : vector<1x16x128xf32>
    %cst = arith.constant 0.000000e+00 : f32
    %14 = vector.broadcast %cst : f32 to vector<10x1x128xf32>
    %c0_7 = arith.constant 0 : index
    %c0_8 = arith.constant 0 : index
    %c0_9 = arith.constant 0 : index
    %15 = vector.load %arg12[%c0_7, %c0_8, %c0_9] : memref<10x18x128xf32, #tpu.memory_space<vmem>>, vector<10x1x128xf32>
    tpu.vector_store %arg12[%c0_7, %c0_8, %c0_9], %14 {strides = array<i32>} : memref<10x18x128xf32, #tpu.memory_space<vmem>>, vector<10x1x128xf32>,
    %c0_10 = arith.constant 0 : index
    %c17 = arith.constant 17 : index
    %c0_11 = arith.constant 0 : index
    %16 = vector.load %arg12[%c0_10, %c17, %c0_11] : memref<10x18x128xf32, #tpu.memory_space<vmem>>, vector<10x1x128xf32>
    tpu.vector_store %arg12[%c0_10, %c17, %c0_11], %14 {strides = array<i32>} : memref<10x18x128xf32, #tpu.memory_space<vmem>>, vector<10x1x128xf32>,
    %c0_12 = arith.constant 0 : index
    %c1 = arith.constant 1 : index
    %c0_13 = arith.constant 0 : index
    %17 = vector.load %arg12[%c0_12, %c1, %c0_13] : memref<10x18x128xf32, #tpu.memory_space<vmem>>, vector<1x16x128xf32>
    tpu.vector_store %arg12[%c0_12, %c1, %c0_13], %6 {strides = array<i32>} : memref<10x18x128xf32, #tpu.memory_space<vmem>>, vector<1x16x128xf32>,
    %c0_14 = arith.constant 0 : index
    %c0_15 = arith.constant 0 : index
    %c0_16 = arith.constant 0 : index
    %c0_17 = arith.constant 0 : index
    %18 = vector.load %arg2[%c0_14, %c0_15, %c0_16, %c0_17] : memref<1x8x16x128xf32, #tpu.memory_space<vmem>>, vector<1x8x16x128xf32>
    %19 = vector.shape_cast %18 : vector<1x8x16x128xf32> to vector<8x16x128xf32>
    %c1_18 = arith.constant 1 : index
    %c1_19 = arith.constant 1 : index
    %c0_20 = arith.constant 0 : index
    %20 = vector.load %arg12[%c1_18, %c1_19, %c0_20] : memref<10x18x128xf32, #tpu.memory_space<vmem>>, vector<8x16x128xf32>
    tpu.vector_store %arg12[%c1_18, %c1_19, %c0_20], %19 {strides = array<i32>} : memref<10x18x128xf32, #tpu.memory_space<vmem>>, vector<8x16x128xf32>,
    %c9 = arith.constant 9 : index
    %c1_21 = arith.constant 1 : index
    %c0_22 = arith.constant 0 : index
    %21 = vector.load %arg12[%c9, %c1_21, %c0_22] : memref<10x18x128xf32, #tpu.memory_space<vmem>>, vector<1x16x128xf32>
    tpu.vector_store %arg12[%c9, %c1_21, %c0_22], %13 {strides = array<i32>} : memref<10x18x128xf32, #tpu.memory_space<vmem>>, vector<1x16x128xf32>,
    %c0_23 = arith.constant 0 : index
    %c0_24 = arith.constant 0 : index
    %c0_25 = arith.constant 0 : index
    %22 = vector.load %arg12[%c0_23, %c0_24, %c0_25] : memref<10x18x128xf32, #tpu.memory_space<vmem>>, vector<10x16x128xf32>
    %c0_26 = arith.constant 0 : index
    %c1_27 = arith.constant 1 : index
    %c0_28 = arith.constant 0 : index
    %23 = vector.load %arg12[%c0_26, %c1_27, %c0_28] : memref<10x18x128xf32, #tpu.memory_space<vmem>>, vector<10x16x128xf32>
    %c0_29 = arith.constant 0 : index
    %c2 = arith.constant 2 : index
    %c0_30 = arith.constant 0 : index
    %24 = vector.load %arg12[%c0_29, %c2, %c0_30] : memref<10x18x128xf32, #tpu.memory_space<vmem>>, vector<10x16x128xf32>
    %c0_31 = arith.constant 0 : index
    %c0_32 = arith.constant 0 : index
    %25 = vector.load %arg5[%c0_31, %c0_32] : memref<9x128xf32, #tpu.memory_space<vmem>>, vector<9x128xf32>
    %cst_33 = arith.constant 0.000000e+00 : f32
    %26 = vector.broadcast %cst_33 : f32 to vector<8x16x128xf32>
    %27 = vector.extract_strided_slice %25 {offsets = [0, 0], sizes = [1, 128], strides = [1, 1]} : vector<9x128xf32> to vector<1x128xf32>
    %28 = vector.shape_cast %27 : vector<1x128xf32> to vector<128xf32>
    %29 = vector.shape_cast %28 : vector<128xf32> to vector<1x1x128xf32>
    %30 = vector.extract_strided_slice %22 {offsets = [0, 0, 0], sizes = [8, 16, 128], strides = [1, 1, 1]} : vector<10x16x128xf32> to vector<8x16x128xf32>
    %31 = vector.broadcast %29 : vector<1x1x128xf32> to vector<8x16x128xf32>
    %32 = arith.mulf %30, %31 : vector<8x16x128xf32>
    %33 = arith.addf %26, %32 : vector<8x16x128xf32>
    %34 = vector.extract_strided_slice %25 {offsets = [1, 0], sizes = [1, 128], strides = [1, 1]} : vector<9x128xf32> to vector<1x128xf32>
    %35 = vector.shape_cast %34 : vector<1x128xf32> to vector<128xf32>
    %36 = vector.shape_cast %35 : vector<128xf32> to vector<1x1x128xf32>
    %37 = vector.extract_strided_slice %23 {offsets = [0, 0, 0], sizes = [8, 16, 128], strides = [1, 1, 1]} : vector<10x16x128xf32> to vector<8x16x128xf32>
    %38 = vector.broadcast %36 : vector<1x1x128xf32> to vector<8x16x128xf32>
    %39 = arith.mulf %37, %38 : vector<8x16x128xf32>
    %40 = arith.addf %33, %39 : vector<8x16x128xf32>
    %41 = vector.extract_strided_slice %25 {offsets = [2, 0], sizes = [1, 128], strides = [1, 1]} : vector<9x128xf32> to vector<1x128xf32>
    %42 = vector.shape_cast %41 : vector<1x128xf32> to vector<128xf32>
    %43 = vector.shape_cast %42 : vector<128xf32> to vector<1x1x128xf32>
    %44 = vector.extract_strided_slice %24 {offsets = [0, 0, 0], sizes = [8, 16, 128], strides = [1, 1, 1]} : vector<10x16x128xf32> to vector<8x16x128xf32>
    %45 = vector.broadcast %43 : vector<1x1x128xf32> to vector<8x16x128xf32>
    %46 = arith.mulf %44, %45 : vector<8x16x128xf32>
    %47 = arith.addf %40, %46 : vector<8x16x128xf32>
    %48 = vector.extract_strided_slice %25 {offsets = [3, 0], sizes = [1, 128], strides = [1, 1]} : vector<9x128xf32> to vector<1x128xf32>
    %49 = vector.shape_cast %48 : vector<1x128xf32> to vector<128xf32>
    %50 = vector.shape_cast %49 : vector<128xf32> to vector<1x1x128xf32>
    %51 = vector.extract_strided_slice %22 {offsets = [1, 0, 0], sizes = [8, 16, 128], strides = [1, 1, 1]} : vector<10x16x128xf32> to vector<8x16x128xf32>
    %52 = vector.broadcast %50 : vector<1x1x128xf32> to vector<8x16x128xf32>
    %53 = arith.mulf %51, %52 : vector<8x16x128xf32>
    %54 = arith.addf %47, %53 : vector<8x16x128xf32>
    %55 = vector.extract_strided_slice %25 {offsets = [4, 0], sizes = [1, 128], strides = [1, 1]} : vector<9x128xf32> to vector<1x128xf32>
    %56 = vector.shape_cast %55 : vector<1x128xf32> to vector<128xf32>
    %57 = vector.shape_cast %56 : vector<128xf32> to vector<1x1x128xf32>
    %58 = vector.extract_strided_slice %23 {offsets = [1, 0, 0], sizes = [8, 16, 128], strides = [1, 1, 1]} : vector<10x16x128xf32> to vector<8x16x128xf32>
    %59 = vector.broadcast %57 : vector<1x1x128xf32> to vector<8x16x128xf32>
    %60 = arith.mulf %58, %59 : vector<8x16x128xf32>
    %61 = arith.addf %54, %60 : vector<8x16x128xf32>
    %62 = vector.extract_strided_slice %25 {offsets = [5, 0], sizes = [1, 128], strides = [1, 1]} : vector<9x128xf32> to vector<1x128xf32>
    %63 = vector.shape_cast %62 : vector<1x128xf32> to vector<128xf32>
    %64 = vector.shape_cast %63 : vector<128xf32> to vector<1x1x128xf32>
    %65 = vector.extract_strided_slice %24 {offsets = [1, 0, 0], sizes = [8, 16, 128], strides = [1, 1, 1]} : vector<10x16x128xf32> to vector<8x16x128xf32>
    %66 = vector.broadcast %64 : vector<1x1x128xf32> to vector<8x16x128xf32>
    %67 = arith.mulf %65, %66 : vector<8x16x128xf32>
    %68 = arith.addf %61, %67 : vector<8x16x128xf32>
    %69 = vector.extract_strided_slice %25 {offsets = [6, 0], sizes = [1, 128], strides = [1, 1]} : vector<9x128xf32> to vector<1x128xf32>
    %70 = vector.shape_cast %69 : vector<1x128xf32> to vector<128xf32>
    %71 = vector.shape_cast %70 : vector<128xf32> to vector<1x1x128xf32>
    %72 = vector.extract_strided_slice %22 {offsets = [2, 0, 0], sizes = [8, 16, 128], strides = [1, 1, 1]} : vector<10x16x128xf32> to vector<8x16x128xf32>
    %73 = vector.broadcast %71 : vector<1x1x128xf32> to vector<8x16x128xf32>
    %74 = arith.mulf %72, %73 : vector<8x16x128xf32>
    %75 = arith.addf %68, %74 : vector<8x16x128xf32>
    %76 = vector.extract_strided_slice %25 {offsets = [7, 0], sizes = [1, 128], strides = [1, 1]} : vector<9x128xf32> to vector<1x128xf32>
    %77 = vector.shape_cast %76 : vector<1x128xf32> to vector<128xf32>
    %78 = vector.shape_cast %77 : vector<128xf32> to vector<1x1x128xf32>
    %79 = vector.extract_strided_slice %23 {offsets = [2, 0, 0], sizes = [8, 16, 128], strides = [1, 1, 1]} : vector<10x16x128xf32> to vector<8x16x128xf32>
    %80 = vector.broadcast %78 : vector<1x1x128xf32> to vector<8x16x128xf32>
    %81 = arith.mulf %79, %80 : vector<8x16x128xf32>
    %82 = arith.addf %75, %81 : vector<8x16x128xf32>
    %83 = vector.extract_strided_slice %25 {offsets = [8, 0], sizes = [1, 128], strides = [1, 1]} : vector<9x128xf32> to vector<1x128xf32>
    %84 = vector.shape_cast %83 : vector<1x128xf32> to vector<128xf32>
    %85 = vector.shape_cast %84 : vector<128xf32> to vector<1x1x128xf32>
    %86 = vector.extract_strided_slice %24 {offsets = [2, 0, 0], sizes = [8, 16, 128], strides = [1, 1, 1]} : vector<10x16x128xf32> to vector<8x16x128xf32>
    %87 = vector.broadcast %85 : vector<1x1x128xf32> to vector<8x16x128xf32>
    %88 = arith.mulf %86, %87 : vector<8x16x128xf32>
    %89 = arith.addf %82, %88 : vector<8x16x128xf32>
    %c0_34 = arith.constant 0 : index
    %c0_35 = arith.constant 0 : index
    %90 = vector.load %arg6[%c0_34, %c0_35] : memref<1x128xf32, #tpu.memory_space<vmem>>, vector<1x128xf32>
    %91 = vector.shape_cast %90 : vector<1x128xf32> to vector<1x1x128xf32>
    %92 = vector.broadcast %91 : vector<1x1x128xf32> to vector<8x16x128xf32>
    %93 = arith.addf %89, %92 : vector<8x16x128xf32>
    %94 = vector.shape_cast %93 : vector<8x16x128xf32> to vector<128x128xf32>
    %95 = arith.truncf %94 : vector<128x128xf32> to vector<128x128xbf16>
    %c0_36 = arith.constant 0 : index
    %c0_37 = arith.constant 0 : index
    %96 = vector.load %arg7[%c0_36, %c0_37] : memref<128x256xbf16, #tpu.memory_space<vmem>>, vector<128x256xbf16>
    %cst_38 = arith.constant dense<0.000000e+00> : vector<128x256xf32>
    %97 = tpu.matmul %95, %96, %cst_38 {dimension_numbers = #tpu.dot_dimension_numbers<[1], [0], [0], [1], [0, 0, 1, 1], [], []>} : vector<128x128xbf16>, vector<128x256xbf16>, vector<128x256xf32> -> vector<128x256xf32>
    %c0_39 = arith.constant 0 : index
    %c0_40 = arith.constant 0 : index
    %98 = vector.load %arg8[%c0_39, %c0_40] : memref<1x256xf32, #tpu.memory_space<vmem>>, vector<1x256xf32>
    %99 = vector.broadcast %98 : vector<1x256xf32> to vector<128x256xf32>
    %100 = arith.addf %97, %99 : vector<128x256xf32>
    %101 = arith.mulf %100, %100 : vector<128x256xf32>
    %102 = arith.mulf %100, %101 : vector<128x256xf32>
    %cst_41 = arith.constant 4.471500e-02 : f32
    %103 = vector.broadcast %cst_41 : f32 to vector<128x256xf32>
    %104 = arith.mulf %103, %102 : vector<128x256xf32>
    %105 = arith.addf %100, %104 : vector<128x256xf32>
    %cst_42 = arith.constant 0.797884583 : f32
    %106 = vector.broadcast %cst_42 : f32 to vector<128x256xf32>
    %107 = arith.mulf %106, %105 : vector<128x256xf32>
    %108 = math.tanh %107 : vector<128x256xf32>
    %cst_43 = arith.constant 1.000000e+00 : f32
    %109 = vector.broadcast %cst_43 : f32 to vector<128x256xf32>
    %110 = arith.addf %109, %108 : vector<128x256xf32>
    %cst_44 = arith.constant 5.000000e-01 : f32
    %111 = vector.broadcast %cst_44 : f32 to vector<128x256xf32>
    %112 = arith.mulf %111, %110 : vector<128x256xf32>
    %113 = arith.mulf %100, %112 : vector<128x256xf32>
    %114 = arith.truncf %113 : vector<128x256xf32> to vector<128x256xbf16>
    %c0_45 = arith.constant 0 : index
    %c0_46 = arith.constant 0 : index
    %115 = vector.load %arg9[%c0_45, %c0_46] : memref<256x128xbf16, #tpu.memory_space<vmem>>, vector<256x128xbf16>
    %cst_47 = arith.constant dense<0.000000e+00> : vector<128x128xf32>
    %116 = tpu.matmul %114, %115, %cst_47 {dimension_numbers = #tpu.dot_dimension_numbers<[1], [0], [0], [1], [0, 0, 1, 1], [], []>} : vector<128x256xbf16>, vector<256x128xbf16>, vector<128x128xf32> -> vector<128x128xf32>
    %c0_48 = arith.constant 0 : index
    %c0_49 = arith.constant 0 : index
    %117 = vector.load %arg10[%c0_48, %c0_49] : memref<1x128xf32, #tpu.memory_space<vmem>>, vector<1x128xf32>
    %118 = vector.broadcast %117 : vector<1x128xf32> to vector<128x128xf32>
    %119 = arith.addf %116, %118 : vector<128x128xf32>
    %c0_50 = arith.constant 0 : index
    %c0_51 = arith.constant 0 : index
    %c0_52 = arith.constant 0 : index
    %c0_53 = arith.constant 0 : index
    %120 = vector.load %arg2[%c0_50, %c0_51, %c0_52, %c0_53] : memref<1x8x16x128xf32, #tpu.memory_space<vmem>>, vector<1x8x16x128xf32>
    %121 = vector.shape_cast %120 : vector<1x8x16x128xf32> to vector<8x16x128xf32>
    %122 = arith.addf %121, %93 : vector<8x16x128xf32>
    %123 = vector.shape_cast %119 : vector<128x128xf32> to vector<8x16x128xf32>
    %124 = arith.addf %122, %123 : vector<8x16x128xf32>
    %c0_54 = arith.constant 0 : index
    %c0_55 = arith.constant 0 : index
    %c0_56 = arith.constant 0 : index
    %c0_57 = arith.constant 0 : index
    %125 = vector.load %arg11[%c0_54, %c0_55, %c0_56, %c0_57] : memref<1x8x16x128xf32, #tpu.memory_space<vmem>>, vector<1x8x16x128xf32>
    %126 = vector.shape_cast %125 : vector<1x8x16x128xf32> to vector<8x16x128xf32>
    %127 = vector.shape_cast %124 : vector<8x16x128xf32> to vector<1x8x16x128xf32>
    tpu.vector_store %arg11[%c0_54, %c0_55, %c0_56, %c0_57], %127 {strides = array<i32>} : memref<1x8x16x128xf32, #tpu.memory_space<vmem>>, vector<1x8x16x128xf32>,
    return
  }
  func.func @transform_0(%arg0: i32, %arg1: i32) -> (i32, i32, i32, i32) {
    %c0_i32 = arith.constant 0 : i32
    %c0_i32_0 = arith.constant 0 : i32
    %c0_i32_1 = arith.constant 0 : i32
    return %arg0, %arg1, %c0_i32, %c0_i32_0 : i32, i32, i32, i32
  }
  func.func @transform_1(%arg0: i32, %arg1: i32) -> (i32, i32, i32, i32) {
    %c8_i32 = arith.constant 8 : i32
    %0 = arith.muli %arg1, %c8_i32 : i32
    %c1_i32 = arith.constant 1 : i32
    %1 = arith.subi %0, %c1_i32 : i32
    %c0_i32 = arith.constant 0 : i32
    %2 = arith.maxsi %1, %c0_i32 : i32
    %c0_i32_0 = arith.constant 0 : i32
    %c0_i32_1 = arith.constant 0 : i32
    %c0_i32_2 = arith.constant 0 : i32
    return %arg0, %2, %c0_i32_0, %c0_i32_1 : i32, i32, i32, i32
  }
  func.func @transform_2(%arg0: i32, %arg1: i32) -> (i32, i32, i32, i32) {
    %c1_i32 = arith.constant 1 : i32
    %0 = arith.addi %arg1, %c1_i32 : i32
    %c8_i32 = arith.constant 8 : i32
    %1 = arith.muli %0, %c8_i32 : i32
    %c15_i32 = arith.constant 15 : i32
    %2 = arith.minsi %1, %c15_i32 : i32
    %c0_i32 = arith.constant 0 : i32
    %c0_i32_0 = arith.constant 0 : i32
    %c0_i32_1 = arith.constant 0 : i32
    return %arg0, %2, %c0_i32, %c0_i32_0 : i32, i32, i32, i32
  }
  func.func @transform_3(%arg0: i32, %arg1: i32) -> (i32, i32) {
    %c0_i32 = arith.constant 0 : i32
    %c0_i32_0 = arith.constant 0 : i32
    %c0_i32_1 = arith.constant 0 : i32
    return %c0_i32, %c0_i32_0 : i32, i32
  }
  func.func @transform_4(%arg0: i32, %arg1: i32) -> (i32, i32) {
    %c0_i32 = arith.constant 0 : i32
    %c0_i32_0 = arith.constant 0 : i32
    %c0_i32_1 = arith.constant 0 : i32
    return %c0_i32, %c0_i32_0 : i32, i32
  }
  func.func @transform_5(%arg0: i32, %arg1: i32) -> (i32, i32) {
    %c0_i32 = arith.constant 0 : i32
    %c0_i32_0 = arith.constant 0 : i32
    %c0_i32_1 = arith.constant 0 : i32
    return %c0_i32, %c0_i32_0 : i32, i32
  }
  func.func @transform_6(%arg0: i32, %arg1: i32) -> (i32, i32) {
    %c0_i32 = arith.constant 0 : i32
    %c0_i32_0 = arith.constant 0 : i32
    %c0_i32_1 = arith.constant 0 : i32
    return %c0_i32, %c0_i32_0 : i32, i32
  }
  func.func @transform_7(%arg0: i32, %arg1: i32) -> (i32, i32) {
    %c0_i32 = arith.constant 0 : i32
    %c0_i32_0 = arith.constant 0 : i32
    %c0_i32_1 = arith.constant 0 : i32
    return %c0_i32, %c0_i32_0 : i32, i32
  }
  func.func @transform_8(%arg0: i32, %arg1: i32) -> (i32, i32) {
    %c0_i32 = arith.constant 0 : i32
    %c0_i32_0 = arith.constant 0 : i32
    %c0_i32_1 = arith.constant 0 : i32
    return %c0_i32, %c0_i32_0 : i32, i32
  }
  func.func @transform_9(%arg0: i32, %arg1: i32) -> (i32, i32, i32, i32) {
    %c0_i32 = arith.constant 0 : i32
    %c0_i32_0 = arith.constant 0 : i32
    %c0_i32_1 = arith.constant 0 : i32
    return %arg0, %arg1, %c0_i32, %c0_i32_0 : i32, i32, i32, i32
  }
}

</mosaic_0001>

<bundles_post_ra>
// kernel: _lambda_.1
= control target key start
LH: loop header
LB: loop body
LE: loop exit
PB: predicated region body
PF: predicated region fallthrough
CT: control target
= control target key end

     0   :  { %s4038_s0 = inlined_call_operand.hbm [shape: f32[2,16,16,128], index: 0, kind: input, shape index: {}, may-alias: {0,1,2}]   ;;  %s4039_s1 = inlined_call_operand.hbm [shape: f32[2,16,16,128], index: 1, kind: input, shape index: {}, may-alias: {0,1,2}]   ;;  %s4040_s2 = inlined_call_operand.hbm [shape: f32[2,16,16,128], index: 2, kind: input, shape index: {}, may-alias: {0,1,2}]   ;;  %s4041_s3 = inlined_call_operand.vmem [shape: f32[9,128], index: 3, kind: input, shape index: {}]   ;;  %s4042_s4 = inlined_call_operand.vmem [shape: f32[1,128], index: 4, kind: input, shape index: {}]   ;;  %s4043_s5 = inlined_call_operand.vmem [shape: bf16[128,256], index: 5, kind: input, shape index: {}]   ;;  %s4044_s6 = inlined_call_operand.vmem [shape: f32[1,256], index: 6, kind: input, shape index: {}]   ;;  %s4045_s7 = inlined_call_operand.vmem [shape: bf16[256,128], index: 7, kind: input, shape index: {}]   ;;  %s4046_s8 = inlined_call_operand.vmem [shape: f32[1,128], index: 8, kind: input, shape index: {}]   ;;  %s4047_s9 = inlined_call_operand.hbm [shape: f32[2,16,16,128], index: 9, kind: output, shape index: {}]  }
   0x1   :  { %4099 = sst [smem:[#allocation34_spill]] %s4038_s0 }
   0x2   :  { %4100 = sst [smem:[#allocation35_spill]] %s4039_s1 }
   0x3   :  { %4101 = sst [smem:[#allocation36_spill]] %s4040_s2 }
   0x4   :  { %4102 = sst [smem:[#allocation37_spill]] %s4041_s3 }
   0x5   :  { %4103 = sst [smem:[#allocation38_spill]] %s4042_s4 }
   0x6   :  { %4104 = sst [smem:[#allocation39_spill]] %s4043_s5 }
   0x7   :  { %4105 = sst [smem:[#allocation40_spill]] %s4044_s6 }
   0x8   :  { %4106 = sst [smem:[#allocation41_spill]] %s4045_s7 }
   0x9   :  { %4107 = sst [smem:[#allocation42_spill]] %s4046_s8 }
   0xa   :  { %4108 = sst [smem:[#allocation43_spill]] %s4047_s9 }
   0xb   :  { %14 = vsyncpa [#allocation4], 0 }
   0xc   :  { %16 = vsyncpa [#allocation4 + $0x1], 0 }
   0xd   :  { %17 = vsyncpa [#allocation7], 0 }
   0xe   :  { %19 = vsyncpa [#allocation7 + $0x1], 0 }
   0xf   :  { %20 = vsyncpa [#allocation5], 0 }
  0x10   :  { %22 = vsyncpa [#allocation5 + $0x1], 0  ;;  %s2655_s30 = smov 0   ;;  %s2657_s10 = smov 0  }
  0x11   :  { %s2659_s11 = smov 0   ;;  %s2661_s12 = smov 0  }
  0x12   :  { %s2663_s13 = smov 0   ;;  %s2665_s14 = smov 0  }
  0x13   :  { %s2667_s15 = smov 0   ;;  %s2669_s16 = smov 0  }
  0x14   :  { %s2671_s17 = smov 0   ;;  %s2673_s18 = smov 0  }
  0x15   :  { %s2675_s19 = smov 0   ;;  %s2677_s20 = smov 0  }
  0x16   :  { %s2679_s21 = smov 0   ;;  %s2681_s22 = smov 0  }
  0x17 LB: > { %4109 = sst [smem:[#allocation14_spill]] %s2557_s13  ;;  %s2726_s23 = sadd.s32 4294967295, %s2593_s22   ;;  %s2593_s22 = sphi %s2681_s22, %s28_s22   ;;  %s2589_s21 = sphi %s2679_s21, %s4208_s21   ;;  %s2585_s20 = sphi %s2677_s20, %s4207_s20   ;;  %s2581_s19 = sphi %s2675_s19, %s4206_s19   ;;  %s2577_s18 = sphi %s2673_s18, %s4205_s18   ;;  %s2573_s17 = sphi %s2671_s17, %s4204_s17   ;;  %s2569_s16 = sphi %s2669_s16, %s4215_s16   ;;  %s2565_s15 = sphi %s2667_s15, %s4214_s15   ;;  %s2561_s14 = sphi %s2665_s14, %s4213_s14   ;;  %s2557_s13 = sphi %s2663_s13, %s4212_s13   ;;  %s2553_s12 = sphi %s2661_s12, %s4201_s12   ;;  %s2549_s11 = sphi %s2659_s11, %s4211_s11   ;;  %s2545_s10 = sphi %s2657_s10, %s4210_s10   ;;  %s2541_s30 = sphi %s2655_s30, %s4209_s30  }
  0x18   : > { %4110 = sst [smem:[#allocation15_spill]] %s2573_s17  ;;  %s37_s24 = sadd.s32 1, %s2585_s20 }
  0x19   : > { %4111 = sst [smem:[#allocation16_spill]] %s2577_s18  ;;  %p38_p0 = scmp.ge.s32.totalorder %s37_s24, 2 }
  0x1a   : > { %4112 = sst [smem:[#allocation17_spill]] %s2581_s19  ;;  %s40_s25 = sadd.s32 1, %s2589_s21 }
  0x1b   : > { %4113 = sst [smem:[#allocation18_spill]] %s2585_s20  ;;  %p4062_p1 = scmp.eq.s32.totalorder %s2593_s22, 0 }
  0x1c   : > { %4114 = sst [smem:[#allocation19_spill]] %s2589_s21  ;;  %p4061_p2 = scmp.eq.s32.totalorder %s2726_s23, 0 }
  0x1d   : > { %s4217_s24 = smov (%p38_p0, %s37_s24), 0  ;;  %s4219_s25 = smov (!%p38_p0, %s40_s25), %s2589_s21 }
  0x1e   : > { %4115 = sst [smem:[#allocation20_spill]] %s4217_s24  ;;  %s45_s26 = ssub.s32 %s2585_s20, %s4217_s24 }
  0x1f   : > { %s1960_s27 = sshll.u32 %s2585_s20, 3  ;;  %p42_p3 = scmp.ge.s32.totalorder %s4219_s25, 2 }
  0x20   : > { %s1961_s28 = sadd.s32 4294967295, %s1960_s27  ;;  %s1962_s29 = sshll.u32 %s4217_s24, 3 }
  0x21   : > { %p74_p4 = scmp.gt.s32.totalorder %s1961_s28, 0  ;;  %s4221_s25 = smov (%p42_p3, %s4219_s25), 0 }
  0x22   : > { %4116 = sst [smem:[#allocation21_spill]] %s4221_s25  ;;  %s2743_s9 = ssub.s32 %s2589_s21, %s4221_s25 }
  0x23   : > { %s4223_s28 = smov (!%p74_p4, %s1961_s28), 0  ;;  %4117 = sst [smem:[#allocation22_spill]] %s2743_s9 }
  0x24   : > { %s1963_s19 = sadd.s32 4294967295, %s1962_s29  ;;  %s2746_s8 = sor.u32 %s45_s26, %s2743_s9 }
  0x25   : > { %p78_p5 = scmp.gt.s32.totalorder %s1963_s19, 0  ;;  %s85_s6 = sadd.s32 1, %s2561_s14 }
  0x26   : > { %p92_p7 = scmp.ne.s32.totalorder %s2561_s14, %s2557_s13  ;;  %p98_p8 = scmp.ne.s32.totalorder %s2557_s13, %s2553_s12 }
  0x27   : > { %s4225_s19 = smov (!%p78_p5, %s1963_s19), 0  ;;  %s2754_s25 = sadd.s32 8, %s1960_s27 }
  0x28   : > { %s81_s24 = ssub.s32 %s4223_s28, %s4225_s19  ;;  %p2759_p9 = por %p92_p7, %p4062_p1 }
  0x29   : > { %s82_s7 = sor.u32 %s81_s24, %s2743_s9  ;;  %p2765_p11 = por %p98_p8, %p4061_p2 }
  0x2a   : > { %p83_p10 = scmp.eq.s32.totalorder %s82_s7, 0  ;;  %s2770_s12 = sadd.s32 8, %s1962_s29 }
  0x2b   : > { %s4119_s4 = scalar_select %p2765_p11, 1, 0 }
  0x2c   : > { %s2773_s19 = scalar_select %p83_p10, %s2561_s14, %s85_s6  }
  0x2d   : > { %4120 = sst [smem:[#allocation23_spill]] %s4119_s4  ;;  %p4060_p0 = scmp.lt.s32.totalorder %s2593_s22, 4 }
  0x2e   : > { %4121 = sst [smem:[#allocation24_spill]] %s2773_s19  ;;  %s2778_s24 = sshll.u32 %s2589_s21, 5 }
  0x2f   : > { %s354_s7 = sand.u32 1, %s2593_s22   ;;  %s356_s27 = sand.u32 1, %s2561_s14  }
  0x30   : > { %s1973_s3 = sshll.u32 %s356_s27, 4  ;;  %s1976_s5 = sshll.u32 %s4223_s28, 1 }
  0x31   : > { %s368_s18 = sadd.s32 %s1976_s5, %s2778_s24  ;;  %s358_s4 = scalar_lea.vmem [#allocation6], %s1973_s3 }
  0x32   : > { %s371_s13 = sshll.u32 %s358_s4, 4  ;;  %s1978_s2 = sshll.u32 %s368_s18, 7  ;;  %s2783_s13 = int_to_ptr.vmem [resolvable:$true] %s371_s13 }
  0x33   : > { %s4122_s1 = sld [smem:[#allocation35_spill]]  ;;  %p2794_p3 = pnand %p4060_p0, %p2759_p9 }
  0x34   : > { %s2800_s3 = scalar_lea.sflag [#allocation7], %s354_s7 }
  0x35   : > { %p2351_p8 = pneg %p2794_p3 }
  0x39   : > { %s2788_s6 = scalar_lea.hbm %s4122_s1, %s1978_s2  ;;  %s2354_s9 = scalar_lea.hbm %s4122_s1, 8192 }
  0x3a   : > { %s2349_s4 = scalar_lea.hbm %s2788_s6, 256  ;;  %p2355_p9 = scmp.lt.u32.totalorder %s2788_s6, %s4122_s1 }
  0x3b   : > { %p2350_p7 = scmp.ne.s32.totalorder %s2788_s6, %s2349_s4  ;;  %p2356_p12 = scmp.lt.u32.totalorder %s2354_s9, %s2349_s4 }
  0x3c   : > { %p2358_p2 = scmp.lt.u32.totalorder %s2349_s4, %s2788_s6 }
  0x3d   : > { %p2352_p10 = pnand %p2351_p8, %p2350_p7  ;;  %p2357_p0 = por %p2356_p12, %p2355_p9 }
  0x3f   : > { %p2353_p13 = pneg %p2352_p10  ;;  %p2359_p1 = por %p2358_p2, %p2357_p0 }
  0x41   : > { %p2360_p6 = pnand %p2359_p1, %p2353_p13 }
  0x43   : > { %2363 = shalt.err (!%p2360_p6)
}
  0x44   : > { %s2364_s26 = scalar_lea.vmem %s2783_s13, 256  ;;  %s2595_s7 = smov [#allocation6]  }
  0x45   : > { %p2365_p7 = scmp.ne.s32.totalorder %s2783_s13, %s2364_s26  ;;  %s2369_s29 = sshll.u32 %s2595_s7, 4  ;;  %s2370_s29 = int_to_ptr.vmem [resolvable:$false] %s2369_s29 }
  0x46   : > { %s2371_s2 = scalar_lea.vmem %s2370_s29, 512  ;;  %p2372_p5 = scmp.lt.s32.totalorder %s2783_s13, %s2370_s29 }
  0x47   : > { %p2367_p10 = pnand %p2365_p7, %p2351_p8  ;;  %p2373_p12 = scmp.lt.s32.totalorder %s2371_s2, %s2364_s26 }
  0x49   : > { %p2368_p4 = pneg %p2367_p10  ;;  %p2374_p9 = por %p2373_p12, %p2372_p5 }
  0x4b   : > { %p2375_p2 = pnand %p2374_p9, %p2368_p4 }
  0x4d   : > { %2378 = shalt.err (!%p2375_p2)
}
  0x4e   : > { %s4063_s4 = smov 128   ;;  %s4065_s5 = smov 8  }
  0x4f   : > { %2117 = dma.hbm_to_vmem [thread:$0]  (!%p2794_p3), %s2788_s6, 256, %s2783_s13, %s2800_s3, %s4063_s4, %s4063_s4, %s4065_s5  }
  0x50   : > { %p4124_p1 = scmp.lt.s32.totalorder %s2593_s22, 5  ;;  %p4125_p6 = scmp.ge.s32.totalorder %s2593_s22, 1 }
  0x51   : > { %s1959_s18 = sadd.s32 4294967294, %s2593_s22   ;;  %s49_s28 = sadd.s32 1, %s2573_s17 }
  0x52   : > { %p2835_p13 = pnand %p4125_p6, %p4124_p1  ;;  %p4127_p0 = scmp.eq.s32.totalorder %s2746_s8, 0 }
  0x53   : > { %p56_p4 = scmp.ne.s32.totalorder %s2573_s17, %s2569_s16  ;;  %p62_p5 = scmp.ne.s32.totalorder %s2569_s16, %s2565_s15 }
  0x54   : > { %s2844_s26 = scalar_select %p4127_p0, %s2573_s17, %s49_s28  }
  0x55   : > { %p286_p8 = scmp.eq.s32.totalorder %s2726_s23, 3  ;;  %p292_p7 = scmp.eq.s32.totalorder %s1959_s18, 3 }
  0x56   : > { %4128 = sst [smem:[#allocation25_spill]] %s2844_s26  ;;  %p4129_p10 = scmp.eq.s32.totalorder %s2593_s22, 0 }
  0x57   : > { %p4131_p3 = scmp.eq.s32.totalorder %s2726_s23, 0  ;;  %p2863_p2 = por %p286_p8, %p56_p4 }
  0x58   : > { %p2853_p12 = por %p4129_p10, %p56_p4  ;;  %p2867_p1 = por %p292_p7, %p62_p5 }
  0x59   : > { %p2859_p9 = por %p4131_p3, %p62_p5  ;;  %s330_s7 = sand.u32 1, %s2573_s17  }
  0x5a   : > { %s4133_s8 = scalar_select %p2863_p2, 1, 0 }
  0x5b   : > { %s4132_s6 = scalar_select %p2859_p9, 1, 0 }
  0x5c   : > { %s4134_s27 = scalar_select %p2867_p1, 1, 0 }
  0x5d   : > { %s2035_s29 = sshll.u32 %s2585_s20, 4  ;;  %s1968_s2 = sshll.u32 %s330_s7, 7 }
  0x5e   : > { %s341_s18 = sadd.s32 %s2035_s29, %s2778_s24  ;;  %s334_s4 = scalar_lea.vmem [#allocation3], %s1968_s2 }
  0x5f   : > { %s1972_s28 = sshll.u32 %s341_s18, 7  ;;  %s344_s5 = sshll.u32 %s334_s4, 4  ;;  %s2879_s5 = int_to_ptr.vmem [resolvable:$true] %s344_s5 }
  0x60   : > { %s4135_s0 = sld [smem:[#allocation34_spill]]  ;;  %p4136_p6 = scmp.lt.s32.totalorder %s2593_s22, 4 }
  0x61   : > { %s2889_s4 = scalar_lea.sflag [#allocation4], %s330_s7 }
  0x62   : > { %p2885_p0 = pnand %p4136_p6, %p2853_p12 }
  0x64   : > { %p2381_p5 = pneg %p2885_p0 }
  0x66   : > { %s2877_s26 = scalar_lea.hbm %s4135_s0, %s1972_s28  ;;  %s2384_s13 = scalar_lea.hbm %s4135_s0, 8192 }
  0x67   : > { %s2379_s29 = scalar_lea.hbm %s2877_s26, 2048  ;;  %p2385_p10 = scmp.lt.u32.totalorder %s2877_s26, %s4135_s0 }
  0x68   : > { %p2380_p4 = scmp.ne.s32.totalorder %s2877_s26, %s2379_s29  ;;  %p2386_p12 = scmp.lt.u32.totalorder %s2384_s13, %s2379_s29 }
  0x69   : > { %p2388_p6 = scmp.lt.u32.totalorder %s2379_s29, %s2877_s26 }
  0x6a   : > { %p2382_p8 = pnand %p2381_p5, %p2380_p4  ;;  %p2387_p3 = por %p2386_p12, %p2385_p10 }
  0x6c   : > { %p2383_p7 = pneg %p2382_p8  ;;  %p2389_p1 = por %p2388_p6, %p2387_p3 }
  0x6e   : > { %p2390_p2 = pnand %p2389_p1, %p2383_p7 }
  0x70   : > { %2393 = shalt.err (!%p2390_p2)
}
  0x71   : > { %s2394_s7 = scalar_lea.vmem %s2879_s5, 2048  ;;  %s2598_s28 = smov [#allocation3]  }
  0x72   : > { %p2395_p4 = scmp.ne.s32.totalorder %s2879_s5, %s2394_s7  ;;  %s2399_s1 = sshll.u32 %s2598_s28, 4  ;;  %s2400_s1 = int_to_ptr.vmem [resolvable:$false] %s2399_s1 }
  0x73   : > { %s2401_s21 = scalar_lea.vmem %s2400_s1, 4096  ;;  %p2402_p9 = scmp.lt.s32.totalorder %s2879_s5, %s2400_s1 }
  0x74   : > { %p2397_p8 = pnand %p2395_p4, %p2381_p5  ;;  %p2403_p10 = scmp.lt.s32.totalorder %s2401_s21, %s2394_s7 }
  0x76   : > { %p2398_p11 = pneg %p2397_p8  ;;  %p2404_p12 = por %p2403_p10, %p2402_p9 }
  0x78   : > { %p2405_p3 = pnand %p2404_p12, %p2398_p11 }
  0x7a   : > { %2408 = shalt.err (!%p2405_p3)
}
  0x7b   : > { %s4138_s29 = smov 8   ;;  %s4139_s13 = smov 128  }
  0x7c   : > { %s4140_s2 = sld [smem:[#allocation22_spill]]  ;;  %p4141_p11 = scmp.lt.s32.totalorder %s2754_s25, 15 }
  0x7d   : > { %2114 = dma.hbm_to_vmem [thread:$0]  (!%p2885_p0), %s2877_s26, 2048, %s2879_s5, %s2889_s4, %s4139_s13, %s4139_s13, %s4138_s29  }
  0x7e   : > { %s4227_s25 = smov (!%p4141_p11, %s2754_s25), 15  ;;  %p4142_p9 = scmp.lt.s32.totalorder %s2770_s12, 15 }
  0x7f   : > { %s121_s20 = sadd.s32 1, %s2549_s11  ;;  %p128_p2 = scmp.ne.s32.totalorder %s2549_s11, %s2545_s10 }
  0x80   : > { %s4229_s12 = smov (!%p4142_p9, %s2770_s12), 15  ;;  %p134_p1 = scmp.ne.s32.totalorder %s2545_s10, %s2541_s30 }
  0x81   : > { %s117_s18 = ssub.s32 %s4227_s25, %s4229_s12  ;;  %p4143_p5 = scmp.eq.s32.totalorder %s2593_s22, 0 }
  0x82   : > { %s118_s7 = sor.u32 %s117_s18, %s4140_s2  ;;  %p4145_p4 = scmp.eq.s32.totalorder %s2726_s23, 0 }
  0x83   : > { %p2934_p7 = por %p128_p2, %p4143_p5  ;;  %p119_p6 = scmp.eq.s32.totalorder %s118_s7, 0 }
  0x84   : > { %p2940_p8 = por %p134_p1, %p4145_p4  ;;  %s383_s26 = sand.u32 1, %s2549_s11  }
  0x85   : > { %s1981_s4 = sshll.u32 %s4227_s25, 1  ;;  %s1979_s12 = sshll.u32 %s383_s26, 4 }
  0x86   : > { %s4146_s5 = scalar_select %p2940_p8, 1, 0 }
  0x87   : > { %s2946_s1 = scalar_select %p119_p6, %s2549_s11, %s121_s20  }
  0x88   : > { %s395_s21 = sadd.s32 %s1981_s4, %s2778_s24  ;;  %s4147_s0 = sld [smem:[#allocation36_spill]] }
  0x89   : > { %s1983_s30 = sshll.u32 %s395_s21, 7  ;;  %s385_s7 = scalar_lea.vmem [#allocation8], %s1979_s12 }
  0x8a   : > { %s398_s19 = sshll.u32 %s385_s7, 4  ;;  %p4148_p0 = scmp.lt.s32.totalorder %s2593_s22, 4  ;;  %s2954_s19 = int_to_ptr.vmem [resolvable:$true] %s398_s19 }
  0x8c   : > { %p2960_p10 = pnand %p4148_p0, %p2934_p7 }
  0x8e   : > { %s2952_s17 = scalar_lea.hbm %s4147_s0, %s1983_s30  ;;  %p2411_p3 = pneg %p2960_p10 }
  0x8f   : > { %s2409_s24 = scalar_lea.hbm %s2952_s17, 256  ;;  %s2414_s4 = scalar_lea.hbm %s4147_s0, 8192 }
  0x90   : > { %p2410_p12 = scmp.ne.s32.totalorder %s2952_s17, %s2409_s24  ;;  %p2415_p2 = scmp.lt.u32.totalorder %s2952_s17, %s4147_s0 }
  0x91   : > { %p2416_p1 = scmp.lt.u32.totalorder %s2414_s4, %s2409_s24  ;;  %p2418_p7 = scmp.lt.u32.totalorder %s2409_s24, %s2952_s17 }
  0x92   : > { %p2412_p11 = pnand %p2411_p3, %p2410_p12 }
  0x93   : > { %p2417_p5 = por %p2416_p1, %p2415_p2 }
  0x94   : > { %p2413_p9 = pneg %p2412_p11 }
  0x95   : > { %p2419_p6 = por %p2418_p7, %p2417_p5 }
  0x97   : > { %p2420_p4 = pnand %p2419_p6, %p2413_p9 }
  0x99   : > { %2423 = shalt.err (!%p2420_p4)
}
  0x9a   : > { %s2424_s21 = scalar_lea.vmem %s2954_s19, 256  ;;  %s2599_s30 = smov [#allocation8]  }
  0x9b   : > { %p2425_p0 = scmp.ne.s32.totalorder %s2954_s19, %s2424_s21  ;;  %s2429_s2 = sshll.u32 %s2599_s30, 4  ;;  %s2430_s2 = int_to_ptr.vmem [resolvable:$false] %s2429_s2 }
  0x9c   : > { %s2431_s18 = scalar_lea.vmem %s2430_s2, 512  ;;  %p2432_p8 = scmp.lt.s32.totalorder %s2954_s19, %s2430_s2 }
  0x9d   : > { %p2427_p12 = pnand %p2425_p0, %p2411_p3  ;;  %p2433_p2 = scmp.lt.s32.totalorder %s2431_s18, %s2424_s21 }
  0x9f   : > { %p2428_p11 = pneg %p2427_p12  ;;  %p2434_p1 = por %p2433_p2, %p2432_p8 }
  0xa1   : > { %p2435_p5 = pnand %p2434_p1, %p2428_p11 }
  0xa3   : > { %2438 = shalt.err (!%p2435_p5)
}
  0xa4   : > { %2120 = dma.hbm_to_vmem [thread:$0]  (!%p2960_p10), %s2952_s17, 256, %s2954_s19, %s2800_s3, %s4139_s13, %s4139_s13, %s4138_s29  }
  0xa5   : > { %410 = sbr.rel (%p2835_p13) target bundleno = 801 (0x321), region = 56 }
  0xac   : > { %s2996_s7 = sand.u32 1, %s2569_s16   ;;  %p4150_p8 = scmp.ne.s32.totalorder %s4132_s6, 0 }
  0xad   : > { %s1985_s24 = sshll.u32 %s2996_s7, 7  ;;  %s413_s20 = scalar_lea.sflag [#allocation4], %s2996_s7 }
  0xae   : > { %s3002_s25 = scalar_lea.vmem [#allocation3], %s1985_s24 }
  0xaf   : > { %2524 = dma.done.wait (%p4150_p8), %s413_s20, 2048  }
  0xb0   : > { %2526 = vsyncadd (%p4150_p8), %s413_s20, 4294965248  ;;  %s4151_s17 = sld [smem:[#allocation14_spill]]  ;;  %s4152_s19 = sld [smem:[#allocation23_spill]] }
  0xb1   : > { %s421_s3 = sand.u32 1, %s2726_s23  }
  0xb2   : > { %s422_s13 = scalar_lea.sflag [#allocation7], %s421_s3 }
  0xb6   : > { %s423_s9 = sand.u32 1, %s4151_s17   ;;  %p4153_p13 = scmp.ne.s32.totalorder %s4152_s19, 0 }
  0xb7   : > { %s3010_s29 = sshll.u32 %s423_s9, 4 }
  0xb8   : > { %s425_s26 = scalar_lea.vmem [#allocation6], %s3010_s29 }
  0xb9   : > { %2528 = dma.done.wait (%p4153_p13), %s422_s13, 256  }
  0xba   : > { %2530 = vsyncadd (%p4153_p13), %s422_s13, 4294967040  ;;  %s432_s4 = sand.u32 1, %s2545_s10   ;;  %p4154_p10 = scmp.ne.s32.totalorder %s4146_s5, 0 }
  0xbb   : > { %s3018_s6 = sshll.u32 %s432_s4, 4 }
  0xbc   : > { %s434_s28 = scalar_lea.vmem [#allocation8], %s3018_s6 }
  0xbd   : > { %2532 = dma.done.wait (%p4154_p10), %s422_s13, 256  }
  0xbe   : > { %2534 = vsyncadd (%p4154_p10), %s422_s13, 4294967040  ;;  %v4076_v0 = vmov 0   ;;  %v2601_v1 = vmov 0.0   ;;  %s4155_s23 = sld [smem:[#allocation16_spill]]  ;;  %s4156_s21 = sld [smem:[#allocation39_spill]]  ;;  %v626_v4 = vlaneseq  ;;  %v490_v18 = vld [vmem:[%s425_s26] sm:$0xff] }
  0xbf   : > { %1121 = vmatprep.mubr.bf16.mxu0 %v4076_v0  ;;  %506 = vst [vmem:[#allocation2] sm:$0x1] %v2601_v1  ;;  %507 = vst [vmem:[#allocation2 + $0x18] sm:$0x1] %v2601_v1  ;;  %v491_v20 = vld [vmem:[%s425_s26 + $0x8] sm:$0xff]  ;;  %v528_v22 = vld [vmem:[%s3002_s25] sm:$0xff] }
  0xc0   : > { %508 = vst [vmem:[#allocation2 + $0x30] sm:$0x1] %v2601_v1  ;;  %516 = vst [vmem:[#allocation2 + $0x11] sm:$0x1] %v2601_v1  ;;  %v3043_v8 = vshrl.u32 %v626_v4, 7  ;;  %v529_v23 = vld [vmem:[%s3002_s25 + $0x8] sm:$0xff] }
  0xc1   : > { %517 = vst [vmem:[#allocation2 + $0x29] sm:$0x1] %v2601_v1  ;;  %518 = vst [vmem:[#allocation2 + $0x41] sm:$0x1] %v2601_v1  ;;  %v530_v28 = vld [vmem:[%s3002_s25 + $0x10] sm:$0xff]  ;;  %v531_v29 = vld [vmem:[%s3002_s25 + $0x18] sm:$0xff] }
  0xc2   : > { %509 = vst [vmem:[#allocation2 + $0x48] sm:$0x1] %v2601_v1  ;;  %510 = vst [vmem:[#allocation2 + $0x60] sm:$0x1] %v2601_v1  ;;  %v4075_v12 = vsub.s32 0, %v3043_v8  ;;  %v4074_v13 = vsub.s32 1, %v3043_v8 }
  0xc3   : > { %511 = vst [vmem:[#allocation2 + $0x78] sm:$0x1] %v2601_v1  ;;  %512 = vst [vmem:[#allocation2 + $0x90] sm:$0x1] %v2601_v1  ;;  %v700_v14 = vsub.s32 2, %v3043_v8  ;;  %v772_v15 = vsub.s32 4, %v3043_v8 }
  0xc4   : > { %513 = vst [vmem:[#allocation2 + $0xa8] sm:$0x1] %v2601_v1  ;;  %514 = vst [vmem:[#allocation2 + $0xc0] sm:$0x1] %v2601_v1  ;;  %p492_p3 = scmp.gt.s32.totalorder %s4155_s23, 0  ;;  %s4157_s2 = smov %s4156_s21  ;;  %v880_v19 = vsub.s32 7, %v3043_v8 }
  0xc5   : > { %515 = vst [vmem:[#allocation2 + $0xd8] sm:$0x1] %v2601_v1  ;;  %519 = vst [vmem:[#allocation2 + $0x59] sm:$0x1] %v2601_v1  ;;  %v2245_v2 = vld [vmem:[%s4156_s21 + $0x4] ss:$8 sps:$4 sm:$0xff]  }
  0xc6   : > { %520 = vst [vmem:[#allocation2 + $0x71] sm:$0x1] %v2601_v1  ;;  %521 = vst [vmem:[#allocation2 + $0x89] sm:$0x1] %v2601_v1  ;;  %s493_s30 = scalar_select %p492_p3, 1, 0  ;;  %1089 = vmatprep.subr.bf16.mxu0 %v2245_v2 }
  0xc7   : > { %522 = vst [vmem:[#allocation2 + $0xa1] sm:$0x1] %v2601_v1  ;;  %523 = vst [vmem:[#allocation2 + $0xb9] sm:$0x1] %v2601_v1  ;;  %v2247_v3 = vld [vmem:[%s4157_s2] ss:$8 sps:$4 sm:$0xff]  }
  0xc8   : > { %524 = vst [vmem:[#allocation2 + $0xd1] sm:$0x1] %v2601_v1  ;;  %525 = vst [vmem:[#allocation2 + $0xe9] sm:$0x1] %v2601_v1  ;;  %p500_p9 = scmp.lt.s32.totalorder %s4155_s23, 1  ;;  %1090 = vmatpush1.bf16.msra.mxu0 %v2247_v3  ;;  %s494_s5 = scvt.s32.f32 %s493_s30  ;;  %v736_v24 = vsub.s32 3, %v3043_v8 }
  0xc9   : > { %v2248_v5 = vld [vmem:[%s4157_s2 + $0x14] ss:$8 sps:$4 sm:$0xff]   ;;  %v2250_v6 = vld [vmem:[%s4157_s2 + $0x10] ss:$8 sps:$4 sm:$0xff]   ;;  %v2251_v7 = vld [vmem:[%s4157_s2 + $0x24] ss:$8 sps:$4 sm:$0xff]  }
  0xca   : > { %1091 = vmatprep.subr.bf16.mxu0 %v2248_v5  ;;  %4158 = vst [vmem:[#allocation26_spill] sm:$0xff] %v3043_v8  ;;  %s3045_s12 = scalar_select %p500_p9, 1, 0  ;;  %v2253_v9 = vld [vmem:[%s4157_s2 + $0x20] ss:$8 sps:$4 sm:$0xff]   ;;  %v495_v11 = vstv %s494_s5  ;;  %v808_v25 = vsub.s32 5, %v3043_v8 }
  0xcb   : > { %v2254_v10 = vld [vmem:[%s4157_s2 + $0x34] ss:$8 sps:$4 sm:$0xff]   ;;  %v2256_v16 = vld [vmem:[%s4157_s2 + $0x30] ss:$8 sps:$4 sm:$0xff]   ;;  %v2257_v17 = vld [vmem:[%s4157_s2 + $0x44] ss:$8 sps:$4 sm:$0xff]   ;;  %v496_v21 = vmul.f32 %v495_v11, %v490_v18  ;;  %v497_v27 = vmul.f32 %v495_v11, %v491_v20 }
  0xcc   : > { %1092 = vmatpush1.bf16.msra.mxu0 %v2250_v6  ;;  %s502_s30 = scvt.s32.f32 %s3045_s12  ;;  %v844_v26 = vsub.s32 6, %v3043_v8  ;;  %545 = vst [vmem:[#allocation2 + $0x19] sm:$0xff] %v528_v22  ;;  %546 = vst [vmem:[#allocation2 + $0x21] sm:$0xff] %v529_v23  ;;  %s4159_s26 = sld [smem:[#allocation37_spill]]  ;;  %v2259_v31 = vld [vmem:[%s4157_s2 + $0x40] ss:$8 sps:$4 sm:$0xff]  }
  0xcd   : > { %1093 = vmatprep.subr.bf16.mxu0 %v2251_v7  ;;  %526 = vst [vmem:[#allocation2 + $0x1] sm:$0xff] %v496_v21  ;;  %547 = vst [vmem:[#allocation2 + $0x31] sm:$0xff] %v530_v28  ;;  %v532_v33 = vld [vmem:[%s3002_s25 + $0x20] sm:$0xff]  ;;  %v533_v40 = vld [vmem:[%s3002_s25 + $0x28] sm:$0xff]  ;;  %s4167_s17 = sld [smem:[#allocation38_spill]]  ;;  %s4184_s29 = sld [smem:[#allocation40_spill]] }
  0xce   : > { %548 = vst [vmem:[#allocation2 + $0x39] sm:$0xff] %v531_v29  ;;  %v3087_v34 = vstv %s502_s30  ;;  %v2260_v35 = vld [vmem:[%s4157_s2 + $0x54] ss:$8 sps:$4 sm:$0xff]   ;;  %527 = vst [vmem:[#allocation2 + $0x9] sm:$0xff] %v497_v27  ;;  %v3104_v41 = vld [vmem:[%s3002_s25 + $0x30] sm:$0xff]  ;;  %s4182_s30 = sld [smem:[#allocation41_spill]] }
  0xcf   : > { %4160 = vst [vmem:[#allocation27_spill] sm:$0xff] %v3087_v34  ;;  %549 = vst [vmem:[#allocation2 + $0x49] sm:$0xff] %v532_v33  ;;  %v3107_v42 = vld [vmem:[%s3002_s25 + $0x38] sm:$0xff]  ;;  %v3121_v47 = vld [vmem:[%s3002_s25 + $0x40] sm:$0xff]  ;;  %s4188_s21 = sld [smem:[#allocation42_spill]]  ;;  %s3892_s18 = scalar_lea.vmem [#allocation9], %s1985_s24 }
  0xd0   : > { %1094 = vmatpush1.bf16.msra.mxu0 %v2253_v9  ;;  %550 = vst [vmem:[#allocation2 + $0x51] sm:$0xff] %v533_v40  ;;  %551 = vst [vmem:[#allocation2 + $0x61] sm:$0xff] %v3104_v41  ;;  %v3124_v48 = vld [vmem:[%s3002_s25 + $0x48] sm:$0xff]  ;;  %v3127_v49 = vld [vmem:[%s3002_s25 + $0x50] sm:$0xff]  ;;  %s4191_s24 = sld [smem:[#allocation17_spill]]  ;;  %s2038_s20 = sshll.u32 %s4155_s23, 4 }
  0xd1   : > { %1095 = vmatprep.subr.bf16.mxu0 %v2254_v10  ;;  %552 = vst [vmem:[#allocation2 + $0x69] sm:$0xff] %v3107_v42  ;;  %4161 = vst [vmem:[#allocation28_spill] sm:$0xff] %v3127_v49  ;;  %v3142_v54 = vld [vmem:[%s3002_s25 + $0x58] sm:$0xff]  ;;  %v3146_v55 = vld [vmem:[%s3002_s25 + $0x60] sm:$0xff]  ;;  %s1819_s23 = sshll.u32 %s3892_s18, 4  ;;  %s4196_s19 = sld [smem:[#allocation43_spill]]  ;;  %s3953_s23 = int_to_ptr.vmem [resolvable:$true] %s1819_s23 }
  0xd2   : > { %v624_v30 = vld [vmem:[%s4159_s26] sm:$0xff]  ;;  %553 = vst [vmem:[#allocation2 + $0x79] sm:$0xff] %v3121_v47  ;;  %554 = vst [vmem:[#allocation2 + $0x81] sm:$0xff] %v3124_v48  ;;  %v3149_v56 = vld [vmem:[%s3002_s25 + $0x68] sm:$0xff]  ;;  %s1803_s4 = scalar_lea.sflag [#allocation5], %s2996_s7  ;;  %p4198_p6 = scmp.ne.s32.totalorder %s4133_s8, 0 }
  0xd3   : > { %v3084_v32 = vrot.slane %v624_v30, %v4074_v13  ;;  %v3094_v36 = vrot.slane %v624_v30, %v4075_v12  ;;  %v3096_v37 = vrot.slane %v624_v30, %v700_v14  ;;  %v3098_v38 = vrot.slane %v624_v30, %v772_v15  ;;  %4162 = vst [vmem:[#allocation29_spill] sm:$0xff] %v3142_v54  ;;  %v3165_v61 = vld [vmem:[%s3002_s25 + $0x70] sm:$0xff]  ;;  %v3168_v62 = vld [vmem:[%s3002_s25 + $0x78] sm:$0xff]  ;;  %v2262_v63 = vld [vmem:[%s4157_s2 + $0x50] ss:$8 sps:$4 sm:$0xff]   ;;  %s2602_s5 = smov [#allocation9]  }
  0xd4   : > { %v3100_v39 = vrot.slane %v624_v30, %v880_v19  ;;  %1096 = vmatpush1.bf16.msra.mxu0 %v2256_v16  ;;  %v3112_v44 = vrot.slane %v624_v30, %v736_v24  ;;  %v3114_v45 = vrot.slane %v624_v30, %v808_v25  ;;  %v3116_v46 = vrot.slane %v624_v30, %v844_v26  ;;  %v2263_v1 = vld [vmem:[%s4157_s2 + $0x64] ss:$8 sps:$4 sm:$0xff]   ;;  %v566_v6 = vld [vmem:[#allocation2 + $0x18] sm:$0xff]  ;;  %v2265_v30 = vld [vmem:[%s4157_s2 + $0x60] ss:$8 sps:$4 sm:$0xff]   ;;  %s4183_s3 = smov %s4182_s30  ;;  %s2443_s12 = sshll.u32 %s2602_s5, 4  ;;  %s2444_s12 = int_to_ptr.vmem [resolvable:$false] %s2443_s12 }
  0xd5   : > { %v3110_v43 = vmul.f32 %v3084_v32, %v496_v21  ;;  %1097 = vmatprep.subr.bf16.mxu0 %v2257_v17  ;;  %v3130_v50 = vmul.f32 %v3084_v32, %v497_v27  ;;  %v3133_v51 = vmul.f32 %v3084_v32, %v528_v22  ;;  %v3136_v52 = vmul.f32 %v3084_v32, %v529_v23  ;;  %v567_v7 = vld [vmem:[#allocation2 + $0x20] sm:$0xff]  ;;  %v568_v17 = vld [vmem:[#allocation2 + $0x30] sm:$0xff]  ;;  %v569_v18 = vld [vmem:[#allocation2 + $0x38] sm:$0xff]  ;;  %p2446_p12 = scmp.lt.s32.totalorder %s3953_s23, %s2444_s12 }
  0xd6   : > { %v670_v53 = vmul.f32 %v3084_v32, %v530_v28  ;;  %555 = vst [vmem:[#allocation2 + $0x91] sm:$0xff] %v3127_v49  ;;  %4163 = vst [vmem:[#allocation30_spill] sm:$0xff] %v3146_v55  ;;  %v671_v57 = vmul.f32 %v3084_v32, %v531_v29  ;;  %v3153_v58 = vmul.f32 %v3098_v38, %v528_v22  ;;  %v606_v9 = vld [vmem:[#allocation2 + $0x1a] sm:$0xff]  ;;  %v604_v24 = vld [vmem:[#allocation2 + $0x2] sm:$0xff] }
  0xd7   : > { %4164 = vst [vmem:[#allocation31_spill] sm:$0xff] %v3149_v56  ;;  %v3156_v59 = vmul.f32 %v3098_v38, %v529_v23  ;;  %v3159_v60 = vmul.f32 %v3098_v38, %v530_v28  ;;  %556 = vst [vmem:[#allocation2 + $0x99] sm:$0xff] %v3142_v54  ;;  %v3177_v2 = vmul.f32 %v3098_v38, %v531_v29  ;;  %v564_v16 = vld [vmem:[#allocation2] sm:$0xff]  ;;  %v565_v23 = vld [vmem:[#allocation2 + $0x8] sm:$0xff]  ;;  %s4197_s9 = smov %s4196_s19 }
  0xd8   : > { %557 = vst [vmem:[#allocation2 + $0xa9] sm:$0xff] %v3146_v55  ;;  %558 = vst [vmem:[#allocation2 + $0xb1] sm:$0xff] %v3149_v56  ;;  %v3180_v3 = vmul.f32 %v3100_v39, %v530_v28  ;;  %v3183_v4 = vmul.f32 %v3100_v39, %v531_v29  ;;  %v3186_v5 = vmul.f32 %v3084_v32, %v532_v33  ;;  %1098 = vmatpush1.bf16.msra.mxu0 %v2259_v31  ;;  %v605_v25 = vld [vmem:[#allocation2 + $0xa] sm:$0xff]  ;;  %v608_v13 = vld [vmem:[#allocation2 + $0x32] sm:$0xff] }
  0xd9   : > { %4165 = vst [vmem:[#allocation32_spill] sm:$0xff] %v3165_v61  ;;  %4166 = vst [vmem:[#allocation33_spill] sm:$0xff] %v3168_v62  ;;  %v3191_v10 = vmul.f32 %v3084_v32, %v533_v40  ;;  %v3194_v11 = vmul.f32 %v3098_v38, %v532_v33  ;;  %v3197_v14 = vmul.f32 %v3098_v38, %v533_v40  ;;  %1099 = vmatprep.subr.bf16.mxu0 %v2260_v35  ;;  %v609_v12 = vld [vmem:[#allocation2 + $0x3a] sm:$0xff] }
  0xda   : > { %559 = vst [vmem:[#allocation2 + $0xc1] sm:$0xff] %v3165_v61  ;;  %560 = vst [vmem:[#allocation2 + $0xc9] sm:$0xff] %v3168_v62  ;;  %v3200_v15 = vmul.f32 %v3100_v39, %v532_v33  ;;  %v632_v19 = vmul.f32 %v3094_v36, %v566_v6  ;;  %v3204_v20 = vmul.f32 %v3100_v39, %v533_v40 }
  0xdb   : > { %v3208_v21 = vmul.f32 %v3084_v32, %v3104_v41  ;;  %v3212_v22 = vmul.f32 %v3084_v32, %v3107_v42  ;;  %v630_v26 = vmul.f32 %v3094_v36, %v564_v16  ;;  %v633_v27 = vmul.f32 %v3094_v36, %v567_v7  ;;  %v607_v16 = vld [vmem:[#allocation2 + $0x22] sm:$0xff] }
  0xdc   : > { %v634_v28 = vmul.f32 %v3094_v36, %v568_v17  ;;  %v635_v29 = vmul.f32 %v3094_v36, %v569_v18  ;;  %v631_v31 = vmul.f32 %v3094_v36, %v565_v23  ;;  %v702_v33 = vmul.f32 %v3096_v37, %v604_v24  ;;  %1100 = vmatpush1.bf16.msra.mxu0 %v2262_v63  ;;  %v2266_v23 = vld [vmem:[%s4157_s2 + $0x74] ss:$8 sps:$4 sm:$0xff]  }
  0xdd   : > { %v703_v35 = vmul.f32 %v3096_v37, %v605_v25  ;;  %v704_v40 = vmul.f32 %v3096_v37, %v606_v9  ;;  %v682_v0 = vadd.f32 %v3110_v43, %v630_v26  ;;  %v738_v62 = vmul.f32 %v3112_v44, %v566_v6  ;;  %1101 = vmatprep.subr.bf16.mxu0 %v2263_v1 }
  0xde   : > { %v686_v8 = vadd.f32 %v670_v53, %v634_v28  ;;  %v687_v34 = vadd.f32 %v671_v57, %v635_v29  ;;  %v683_v24 = vadd.f32 %v3130_v50, %v631_v31  ;;  %v706_v25 = vmul.f32 %v3096_v37, %v608_v13  ;;  %v2268_v28 = vld [vmem:[%s4157_s2 + $0x70] ss:$8 sps:$4 sm:$0xff]  }
  0xdf   : > { %v707_v63 = vmul.f32 %v3096_v37, %v609_v12  ;;  %v739_v61 = vmul.f32 %v3112_v44, %v567_v7  ;;  %v705_v56 = vmul.f32 %v3096_v37, %v607_v16  ;;  %v718_v43 = vadd.f32 %v702_v33, %v682_v0  ;;  %v570_v33 = vld [vmem:[#allocation2 + $0x48] sm:$0xff] }
  0xe0   : > { %v740_v53 = vmul.f32 %v3112_v44, %v568_v17  ;;  %v741_v57 = vmul.f32 %v3112_v44, %v569_v18  ;;  %v719_v1 = vadd.f32 %v703_v35, %v683_v24  ;;  %v810_v6 = vmul.f32 %v3114_v45, %v606_v9  ;;  %1102 = vmatpush1.bf16.msra.mxu0 %v2265_v30  ;;  %v571_v35 = vld [vmem:[#allocation2 + $0x50] sm:$0xff] }
  0xe1   : > { %v811_v26 = vmul.f32 %v3114_v45, %v607_v16  ;;  %v812_v50 = vmul.f32 %v3114_v45, %v608_v13  ;;  %v3243_v7 = vadd.f32 %v706_v25, %v686_v8  ;;  %v3245_v29 = vadd.f32 %v707_v63, %v687_v34  ;;  %1103 = vmatprep.subr.bf16.mxu0 %v2266_v23  ;;  %v610_v24 = vld [vmem:[#allocation2 + $0x4a] sm:$0xff]  ;;  %v3254_v8 = vld [vmem:[%s4159_s26 + $0x8] ss:$0 sm:$0xff] }
  0xe2   : > { %v754_v0 = vadd.f32 %v738_v62, %v718_v43  ;;  %v846_v31 = vmul.f32 %v3116_v46, %v568_v17  ;;  %v755_v9 = vadd.f32 %v739_v61, %v719_v1  ;;  %v847_v16 = vmul.f32 %v3116_v46, %v569_v18  ;;  %v611_v62 = vld [vmem:[#allocation2 + $0x52] sm:$0xff] }
  0xe3   : > { %v636_v30 = vmul.f32 %v3094_v36, %v570_v33  ;;  %v637_v55 = vmul.f32 %v3094_v36, %v571_v35  ;;  %v684_v17 = vadd.f32 %v3133_v51, %v632_v19  ;;  %v685_v23 = vadd.f32 %v3136_v52, %v633_v27 }
  0xe4   : > { %v790_v34 = vadd.f32 %v3153_v58, %v754_v0  ;;  %v708_v61 = vmul.f32 %v3096_v37, %v610_v24  ;;  %v791_v18 = vadd.f32 %v3156_v59, %v755_v9  ;;  %v709_v43 = vmul.f32 %v3096_v37, %v611_v62  ;;  %1104 = vmatpush1.bf16.msra.mxu0 %v2268_v28  ;;  %v573_v9 = vld [vmem:[#allocation2 + $0x68] sm:$0xff] }
  0xe5   : > { %v688_v25 = vadd.f32 %v3186_v5, %v636_v30  ;;  %v689_v63 = vadd.f32 %v3191_v10, %v637_v55  ;;  %v813_v1 = vmul.f32 %v3114_v45, %v609_v12  ;;  %v720_v58 = vadd.f32 %v704_v40, %v684_v17  ;;  %v572_v10 = vld [vmem:[#allocation2 + $0x60] sm:$0xff] }
  0xe6   : > { %v826_v54 = vadd.f32 %v810_v6, %v790_v34  ;;  %v721_v0 = vadd.f32 %v705_v56, %v685_v23  ;;  %v827_v49 = vadd.f32 %v811_v26, %v791_v18  ;;  %v918_v51 = vmul.f32 %v3254_v8, %v608_v13  ;;  %v3273_v40 = vld [vmem:[%s4167_s17] ss:$0 sm:$0xff]  ;;  %v612_v6 = vld [vmem:[#allocation2 + $0x62] sm:$0xff]  ;;  %v613_v26 = vld [vmem:[#allocation2 + $0x6a] sm:$0xff]  ;;  %s2027_s17 = sshll.u32 %s4191_s24, 5 }
  0xe7   : > { %v919_v52 = vmul.f32 %v3254_v8, %v609_v12  ;;  %v742_v19 = vmul.f32 %v3112_v44, %v570_v33  ;;  %v3268_v27 = vadd.f32 %v708_v61, %v688_v25  ;;  %v756_v5 = vadd.f32 %v740_v53, %v720_v58  ;;  %s1816_s6 = sadd.s32 %s2038_s20, %s2027_s17 }
  0xe8   : > { %v862_v59 = vadd.f32 %v846_v31, %v826_v54  ;;  %v757_v55 = vadd.f32 %v741_v57, %v721_v0  ;;  %v863_v28 = vadd.f32 %v847_v16, %v827_v49  ;;  %v3275_v56 = vadd.f32 %v709_v43, %v689_v63 }
  0xe9   : > { %v743_v13 = vmul.f32 %v3112_v44, %v571_v35  ;;  %v848_v12 = vmul.f32 %v3116_v46, %v570_v33  ;;  %v792_v53 = vadd.f32 %v3159_v60, %v756_v5  ;;  %v849_v49 = vmul.f32 %v3116_v46, %v571_v35 }
  0xea   : > { %v898_v54 = vadd.f32 %v3180_v3, %v862_v59  ;;  %v793_v57 = vadd.f32 %v3177_v2, %v757_v55  ;;  %v899_v31 = vadd.f32 %v3183_v4, %v863_v28  ;;  %v920_v16 = vmul.f32 %v3254_v8, %v610_v24 }
  0xeb   : > { %v638_v30 = vmul.f32 %v3094_v36, %v572_v10  ;;  %v639_v34 = vmul.f32 %v3094_v36, %v573_v9  ;;  %v828_v33 = vadd.f32 %v812_v50, %v792_v53  ;;  %v710_v3 = vmul.f32 %v3096_v37, %v612_v6  ;;  %v574_v53 = vld [vmem:[#allocation2 + $0x78] sm:$0xff] }
  0xec   : > { %v934_v17 = vadd.f32 %v918_v51, %v898_v54  ;;  %v829_v23 = vadd.f32 %v813_v1, %v793_v57  ;;  %v935_v61 = vadd.f32 %v919_v52, %v899_v31  ;;  %v711_v35 = vmul.f32 %v3096_v37, %v613_v26 }
  0xed   : > { %v690_v60 = vadd.f32 %v3208_v21, %v638_v30  ;;  %v691_v2 = vadd.f32 %v3212_v22, %v639_v34  ;;  %v864_v18 = vadd.f32 %v848_v12, %v828_v33  ;;  %v921_v63 = vmul.f32 %v3254_v8, %v611_v62  ;;  %v575_v34 = vld [vmem:[#allocation2 + $0x80] sm:$0xff] }
  0xee   : > { %v3292_v4 = vadd.f32 %v3273_v40, %v934_v17  ;;  %v865_v25 = vadd.f32 %v849_v49, %v829_v23  ;;  %v3296_v43 = vadd.f32 %v3273_v40, %v935_v61  ;;  %v814_v50 = vmul.f32 %v3114_v45, %v610_v24  ;;  %v614_v33 = vld [vmem:[#allocation2 + $0x7a] sm:$0xff] }
  0xef   : > { %v815_v1 = vmul.f32 %v3114_v45, %v611_v62  ;;  %v744_v21 = vmul.f32 %v3112_v44, %v572_v10  ;;  %v900_v22 = vadd.f32 %v3200_v15, %v864_v18  ;;  %v758_v0 = vadd.f32 %v742_v19, %v3243_v7 }
  0xf0   : > { %v901_v58 = vadd.f32 %v3204_v20, %v865_v25  ;;  %v759_v51 = vadd.f32 %v743_v13, %v3245_v29  ;;  %v973_v52 = vpack.c.bf16 %v3296_v43, %v3292_v4  ;;  %v3307_v59 = vadd.f32 %v710_v3, %v690_v60 }
  0xf1   : > { %v3309_v5 = vadd.f32 %v711_v35, %v691_v2  ;;  %v745_v24 = vmul.f32 %v3112_v44, %v573_v9  ;;  %v936_v62 = vadd.f32 %v920_v16, %v900_v22  ;;  %v794_v28 = vadd.f32 %v3194_v11, %v758_v0 }
  0xf2   : > { %v937_v55 = vadd.f32 %v921_v63, %v901_v58  ;;  %v795_v15 = vadd.f32 %v3197_v14, %v759_v51  ;;  %1122 = vmatmul.mubr.bf16.vlgmr.msra.gmra.mrb[0].mxu0 %v973_v52  ;;  %v780_v20 = vmul.f32 %v3098_v38, %v3104_v41  ;;  %v850_v7 = vmul.f32 %v3116_v46, %v572_v10 }
  0xf3   : > { %v851_v29 = vmul.f32 %v3116_v46, %v573_v9  ;;  %v886_v19 = vmul.f32 %v3100_v39, %v3104_v41  ;;  %v4168_v13 = vmov 0   ;;  %v3322_v12 = vadd.f32 %v3273_v40, %v936_v62 }
  0xf4   : > { %1131 = vmatprep.mubr.bf16.mxu0 %v4168_v13  ;;  %v3325_v11 = vadd.f32 %v3273_v40, %v937_v55  ;;  %v830_v14 = vadd.f32 %v814_v50, %v794_v28  ;;  %v831_v54 = vadd.f32 %v815_v1, %v795_v15  ;;  %v781_v57 = vmul.f32 %v3098_v38, %v3107_v42 }
  0xf5   : > { %v816_v10 = vmul.f32 %v3114_v45, %v612_v6  ;;  %v887_v9 = vmul.f32 %v3100_v39, %v3107_v42  ;;  %v640_v41 = vmul.f32 %v3094_v36, %v574_v53  ;;  %v922_v16 = vmul.f32 %v3254_v8, %v612_v6  ;;  %v615_v6 = vld [vmem:[#allocation2 + $0x82] sm:$0xff] }
  0xf6   : > { %v866_v49 = vadd.f32 %v850_v7, %v830_v14  ;;  %v867_v31 = vadd.f32 %v851_v29, %v831_v54  ;;  %v923_v30 = vmul.f32 %v3254_v8, %v613_v26  ;;  %v974_v17 = vpack.c.bf16 %v3325_v11, %v3322_v12  ;;  %v576_v54 = vld [vmem:[#allocation2 + $0x90] sm:$0xff] }
  0xf7   : > { %v641_v23 = vmul.f32 %v3094_v36, %v575_v34  ;;  %v676_v3 = vmul.f32 %v3084_v32, %v3121_v47  ;;  %v677_v42 = vmul.f32 %v3084_v32, %v3124_v48  ;;  %v817_v61 = vmul.f32 %v3114_v45, %v613_v26 }
  0xf8   : > { %v902_v60 = vadd.f32 %v886_v19, %v866_v49  ;;  %v903_v2 = vadd.f32 %v887_v9, %v867_v31  ;;  %v712_v35 = vmul.f32 %v3096_v37, %v614_v33  ;;  %v713_v25 = vmul.f32 %v3096_v37, %v615_v6  ;;  %v616_v31 = vld [vmem:[#allocation2 + $0x92] sm:$0xff] }
  0xf9   : > { %v692_v18 = vadd.f32 %v676_v3, %v640_v41  ;;  %v760_v63 = vadd.f32 %v744_v21, %v3268_v27  ;;  %v761_v50 = vadd.f32 %v745_v24, %v3275_v56  ;;  %v746_v58 = vmul.f32 %v3112_v44, %v574_v53  ;;  %v577_v41 = vld [vmem:[#allocation2 + $0x98] sm:$0xff] }
  0xfa   : > { %v938_v1 = vadd.f32 %v922_v16, %v902_v60  ;;  %v939_v22 = vadd.f32 %v923_v30, %v903_v2  ;;  %v747_v0 = vmul.f32 %v3112_v44, %v575_v34  ;;  %1132 = vmatmul.mubr.bf16.gmra.mrb[4].mxu0 %v974_v17  ;;  %v693_v26 = vadd.f32 %v677_v42, %v641_v23  ;;  %v4169_v30 = vld [vmem:[#allocation28_spill] sm:$0xff] }
  0xfb   : > { %v782_v51 = vmul.f32 %v3098_v38, %v3121_v47  ;;  %v796_v52 = vadd.f32 %v780_v20, %v760_v63  ;;  %v797_v62 = vadd.f32 %v781_v57, %v761_v50  ;;  %1141 = vmatprep.mubr.bf16.mxu0 %v4168_v13  ;;  %v3358_v56 = vadd.f32 %v712_v35, %v692_v18  ;;  %v617_v42 = vld [vmem:[#allocation2 + $0x9a] sm:$0xff] }
  0xfc   : > { %v3353_v55 = vadd.f32 %v3273_v40, %v938_v1  ;;  %v3356_v27 = vadd.f32 %v3273_v40, %v939_v22  ;;  %v783_v21 = vmul.f32 %v3098_v38, %v3124_v48  ;;  %v852_v15 = vmul.f32 %v3116_v46, %v574_v53 }
  0xfd   : > { %v832_v24 = vadd.f32 %v816_v10, %v796_v52  ;;  %v833_v28 = vadd.f32 %v817_v61, %v797_v62  ;;  %v853_v20 = vmul.f32 %v3116_v46, %v575_v34  ;;  %v888_v29 = vmul.f32 %v3100_v39, %v3121_v47  ;;  %v4170_v34 = vld [vmem:[#allocation29_spill] sm:$0xff] }
  0xfe   : > { %v975_v7 = vpack.c.bf16 %v3356_v27, %v3353_v55  ;;  %v889_v19 = vmul.f32 %v3100_v39, %v3124_v48  ;;  %v924_v14 = vmul.f32 %v3254_v8, %v614_v33  ;;  %v925_v10 = vmul.f32 %v3254_v8, %v615_v6 }
  0xff   : > { %v868_v57 = vadd.f32 %v852_v15, %v832_v24  ;;  %v869_v9 = vadd.f32 %v853_v20, %v833_v28  ;;  %v642_v53 = vmul.f32 %v3094_v36, %v576_v54  ;;  %v729_v49 = vadd.f32 %v713_v25, %v693_v26 }
 0x100   : > { %v643_v16 = vmul.f32 %v3094_v36, %v577_v41  ;;  %v678_v47 = vmul.f32 %v3084_v32, %v4169_v30  ;;  %v679_v48 = vmul.f32 %v3084_v32, %v4170_v34  ;;  %v818_v17 = vmul.f32 %v3114_v45, %v614_v33 }
 0x101   : > { %v904_v23 = vadd.f32 %v888_v29, %v868_v57  ;;  %v905_v3 = vadd.f32 %v889_v19, %v869_v9  ;;  %v714_v61 = vmul.f32 %v3096_v37, %v616_v31  ;;  %v715_v35 = vmul.f32 %v3096_v37, %v617_v42  ;;  %v578_v29 = vld [vmem:[#allocation2 + $0xa8] sm:$0xff]  ;;  %v579_v57 = vld [vmem:[#allocation2 + $0xb0] sm:$0xff] }
 0x102   : > { %v694_v60 = vadd.f32 %v678_v47, %v642_v53  ;;  %v695_v2 = vadd.f32 %v679_v48, %v643_v16  ;;  %v762_v18 = vadd.f32 %v746_v58, %v3307_v59  ;;  %1142 = vmatmul.mubr.bf16.gmra.mrb[8].mxu0 %v975_v7  ;;  %v819_v25 = vmul.f32 %v3114_v45, %v615_v6  ;;  %v4171_v53 = vld [vmem:[#allocation30_spill] sm:$0xff] }
 0x103   : > { %v940_v63 = vadd.f32 %v924_v14, %v904_v23  ;;  %v941_v50 = vadd.f32 %v925_v10, %v905_v3  ;;  %v763_v1 = vadd.f32 %v747_v0, %v3309_v5  ;;  %1151 = vmatprep.mubr.bf16.mxu0 %v4168_v13  ;;  %v748_v33 = vmul.f32 %v3112_v44, %v576_v54  ;;  %v618_v10 = vld [vmem:[#allocation2 + $0xaa] sm:$0xff]  ;;  %v619_v3 = vld [vmem:[#allocation2 + $0xb2] sm:$0xff] }
 0x104   : > { %v749_v22 = vmul.f32 %v3112_v44, %v577_v41  ;;  %v784_v26 = vmul.f32 %v3098_v38, %v4169_v30  ;;  %v798_v52 = vadd.f32 %v782_v51, %v762_v18  ;;  %v730_v6 = vadd.f32 %v714_v61, %v694_v60 }
 0x105   : > { %v3390_v62 = vadd.f32 %v3273_v40, %v940_v63  ;;  %v3393_v59 = vadd.f32 %v3273_v40, %v941_v50  ;;  %v799_v58 = vadd.f32 %v783_v21, %v763_v1  ;;  %v3395_v24 = vadd.f32 %v715_v35, %v695_v2 }
 0x106   : > { %v834_v5 = vadd.f32 %v818_v17, %v798_v52  ;;  %v854_v0 = vmul.f32 %v3116_v46, %v576_v54  ;;  %v855_v28 = vmul.f32 %v3116_v46, %v577_v41  ;;  %v890_v51 = vmul.f32 %v3100_v39, %v4169_v30  ;;  %v4172_v30 = vld [vmem:[#allocation31_spill] sm:$0xff] }
 0x107   : > { %v976_v15 = vpack.c.bf16 %v3393_v59, %v3390_v62  ;;  %v835_v20 = vadd.f32 %v819_v25, %v799_v58  ;;  %v891_v7 = vmul.f32 %v3100_v39, %v4170_v34  ;;  %v926_v21 = vmul.f32 %v3254_v8, %v616_v31 }
 0x108   : > { %v870_v19 = vadd.f32 %v854_v0, %v834_v5  ;;  %v927_v14 = vmul.f32 %v3254_v8, %v617_v42  ;;  %v644_v54 = vmul.f32 %v3094_v36, %v578_v29  ;;  %v645_v41 = vmul.f32 %v3094_v36, %v579_v57 }
 0x109   : > { %v871_v9 = vadd.f32 %v855_v28, %v835_v20  ;;  %v680_v16 = vmul.f32 %v3084_v32, %v4171_v53  ;;  %v681_v47 = vmul.f32 %v3084_v32, %v4172_v30  ;;  %v785_v48 = vmul.f32 %v3098_v38, %v4170_v34 }
 0x10a   : > { %v820_v17 = vmul.f32 %v3114_v45, %v616_v31  ;;  %v906_v23 = vadd.f32 %v890_v51, %v870_v19  ;;  %v716_v61 = vmul.f32 %v3096_v37, %v618_v10  ;;  %1152 = vmatmul.mubr.bf16.gmra.mrb[12].mxu0 %v976_v15  ;;  %v717_v36 = vmul.f32 %v3096_v37, %v619_v3 }
 0x10b   : > { %v907_v60 = vadd.f32 %v891_v7, %v871_v9  ;;  %v696_v2 = vadd.f32 %v680_v16, %v644_v54  ;;  %v697_v35 = vadd.f32 %v681_v47, %v645_v41  ;;  %1161 = vmatprep.mubr.bf16.mxu0 %v4168_v13  ;;  %v821_v18 = vmul.f32 %v3114_v45, %v617_v42  ;;  %v620_v47 = vld [vmem:[#allocation2 + $0xc2] sm:$0xff] }
 0x10c   : > { %v942_v32 = vadd.f32 %v926_v21, %v906_v23  ;;  %v764_v25 = vadd.f32 %v748_v33, %v3358_v56  ;;  %v765_v34 = vadd.f32 %v749_v22, %v729_v49  ;;  %v750_v31 = vmul.f32 %v3112_v44, %v578_v29 }
 0x10d   : > { %v943_v63 = vadd.f32 %v927_v14, %v907_v60  ;;  %v751_v50 = vmul.f32 %v3112_v44, %v579_v57  ;;  %v786_v1 = vmul.f32 %v3098_v38, %v4171_v53  ;;  %v732_v37 = vadd.f32 %v716_v61, %v696_v2  ;;  %v580_v14 = vld [vmem:[#allocation2 + $0xc0] sm:$0xff]  ;;  %v4174_v61 = vld [vmem:[#allocation33_spill] sm:$0xff] }
 0x10e   : > { %v3426_v52 = vadd.f32 %v3273_v40, %v942_v32  ;;  %v800_v58 = vadd.f32 %v784_v26, %v764_v25  ;;  %v801_v5 = vadd.f32 %v785_v48, %v765_v34  ;;  %v733_v0 = vadd.f32 %v717_v36, %v697_v35  ;;  %v4173_v48 = vld [vmem:[#allocation32_spill] sm:$0xff] }
 0x10f   : > { %v3429_v42 = vadd.f32 %v3273_v40, %v943_v63  ;;  %v856_v56 = vmul.f32 %v3116_v46, %v578_v29  ;;  %v857_v49 = vmul.f32 %v3116_v46, %v579_v57  ;;  %v892_v28 = vmul.f32 %v3100_v39, %v4171_v53  ;;  %v581_v57 = vld [vmem:[#allocation2 + $0xc8] sm:$0xff] }
 0x110   : > { %v836_v33 = vadd.f32 %v820_v17, %v800_v58  ;;  %v837_v22 = vadd.f32 %v821_v18, %v801_v5  ;;  %v893_v15 = vmul.f32 %v3100_v39, %v4172_v30  ;;  %v787_v20 = vmul.f32 %v3098_v38, %v4172_v30  ;;  %v621_v18 = vld [vmem:[#allocation2 + $0xca] sm:$0xff] }
 0x111   : > { %v977_v26 = vpack.c.bf16 %v3429_v42, %v3426_v52  ;;  %v822_v51 = vmul.f32 %v3114_v45, %v618_v10  ;;  %v928_v7 = vmul.f32 %v3254_v8, %v618_v10  ;;  %v929_v21 = vmul.f32 %v3254_v8, %v619_v3 }
 0x112   : > { %v872_v29 = vadd.f32 %v856_v56, %v836_v33  ;;  %v873_v19 = vadd.f32 %v857_v49, %v837_v22  ;;  %v766_v54 = vadd.f32 %v750_v31, %v730_v6  ;;  %v823_v9 = vmul.f32 %v3114_v45, %v619_v3  ;;  %v498_v6 = vld [vmem:[%s434_s28] sm:$0xff]  ;;  %v4175_v31 = vld [vmem:[#allocation27_spill] sm:$0xff] }
 0x113   : > { %1162 = vmatmul.mubr.bf16.gmra.mrb[16].mxu0 %v977_v26  ;;  %v752_v41 = vmul.f32 %v3112_v44, %v580_v14  ;;  %v753_v53 = vmul.f32 %v3112_v44, %v581_v57  ;;  %v767_v16 = vadd.f32 %v751_v50, %v3395_v24  ;;  %v788_v17 = vmul.f32 %v3098_v38, %v4173_v48  ;;  %v499_v24 = vld [vmem:[%s434_s28 + $0x8] sm:$0xff]  ;;  %s2028_s28 = sshll.u32 %s1816_s6, 7 }
 0x114   : > { %1171 = vmatprep.mubr.bf16.mxu0 %v4168_v13  ;;  %v908_v10 = vadd.f32 %v892_v28, %v872_v29  ;;  %v909_v30 = vadd.f32 %v893_v15, %v873_v19  ;;  %v802_v23 = vadd.f32 %v786_v1, %v766_v54  ;;  %v789_v3 = vmul.f32 %v3098_v38, %v4174_v61  ;;  %s3959_s13 = scalar_lea.hbm %s4196_s19, %s2028_s28 }
 0x115   : > { %v803_v60 = vadd.f32 %v787_v20, %v767_v16  ;;  %v858_v2 = vmul.f32 %v3116_v46, %v580_v14  ;;  %v859_v44 = vmul.f32 %v3116_v46, %v581_v57  ;;  %v894_v25 = vmul.f32 %v3100_v39, %v4173_v48 }
 0x116   : > { %v944_v35 = vadd.f32 %v928_v7, %v908_v10  ;;  %v945_v36 = vadd.f32 %v929_v21, %v909_v30  ;;  %v838_v32 = vadd.f32 %v822_v51, %v802_v23  ;;  %v895_v63 = vmul.f32 %v3100_v39, %v4174_v61 }
 0x117   : > { %v839_v34 = vadd.f32 %v823_v9, %v803_v60  ;;  %v930_v38 = vmul.f32 %v3254_v8, %v620_v47  ;;  %v504_v50 = vmul.f32 %v4175_v31, %v498_v6  ;;  %v505_v56 = vmul.f32 %v4175_v31, %v499_v24  ;;  %v2280_v31 = vld [vmem:[%s4183_s3 + $0x28] sm:$0xff]  }
 0x118   : > { %v3466_v1 = vadd.f32 %v3273_v40, %v944_v35  ;;  %v3469_v58 = vadd.f32 %v3273_v40, %v945_v36  ;;  %v874_v5 = vadd.f32 %v858_v2, %v838_v32  ;;  %v931_v33 = vmul.f32 %v3254_v8, %v621_v18  ;;  %v2271_v35 = vld [vmem:[%s4183_s3 + $0x48] sm:$0xff]   ;;  %v2273_v36 = vld [vmem:[%s4183_s3 + $0x50] sm:$0xff]   ;;  %v2275_v32 = vld [vmem:[%s4183_s3 + $0x58] sm:$0xff]  }
 0x119   : > { %v875_v49 = vadd.f32 %v859_v44, %v839_v34  ;;  %562 = vst [vmem:[#allocation2 + $0xd9] sm:$0xff] %v504_v50  ;;  %v768_v22 = vadd.f32 %v752_v41, %v732_v37  ;;  %v769_v28 = vadd.f32 %v753_v53, %v733_v0  ;;  %563 = vst [vmem:[#allocation2 + $0xe1] sm:$0xff] %v505_v56  ;;  %v2277_v34 = vld [vmem:[%s4183_s3 + $0x60] sm:$0xff]  }
 0x11a   : > { %4176 = vst [vmem:[#allocation28_spill] sm:$0xff] %v3466_v1  ;;  %4177 = vst [vmem:[#allocation29_spill] sm:$0xff] %v3469_v58  ;;  %v978_v15 = vpack.c.bf16 %v3469_v58, %v3466_v1  ;;  %v910_v26 = vadd.f32 %v894_v25, %v874_v5  ;;  %v824_v20 = vmul.f32 %v3114_v45, %v620_v47  ;;  %v2276_v25 = vld [vmem:[%s4183_s3 + $0x18] sm:$0xff]   ;;  %v2282_v5 = vld [vmem:[%s4183_s3 + $0x30] sm:$0xff]  }
 0x11b   : > { %v911_v51 = vadd.f32 %v895_v63, %v875_v49  ;;  %v804_v7 = vadd.f32 %v788_v17, %v768_v22  ;;  %v805_v29 = vadd.f32 %v789_v3, %v769_v28  ;;  %v825_v19 = vmul.f32 %v3114_v45, %v621_v18  ;;  %v2274_v18 = vld [vmem:[%s4183_s3 + $0x10] sm:$0xff]   ;;  %v2278_v63 = vld [vmem:[%s4183_s3 + $0x20] sm:$0xff]   ;;  %v2284_v49 = vld [vmem:[%s4183_s3 + $0x38] sm:$0xff]  }
 0x11c   : > { %1172 = vmatmul.mubr.bf16.gmra.mrb[20].mxu0 %v978_v15  ;;  %v946_v21 = vadd.f32 %v930_v38, %v910_v26  ;;  %v896_v30 = vmul.f32 %v3100_v39, %v504_v50  ;;  %v897_v48 = vmul.f32 %v3100_v39, %v505_v56  ;;  %v2279_v38 = vld [vmem:[%s4183_s3 + $0x68] sm:$0xff]   ;;  %v2281_v50 = vld [vmem:[%s4183_s3 + $0x70] sm:$0xff]   ;;  %v2283_v56 = vld [vmem:[%s4183_s3 + $0x78] sm:$0xff]  }
 0x11d   : > { %1181 = vmatprep.mubr.bf16.mxu0 %v4168_v13  ;;  %v947_v14 = vadd.f32 %v931_v33, %v911_v51  ;;  %v840_v57 = vadd.f32 %v824_v20, %v804_v7  ;;  %v841_v9 = vadd.f32 %v825_v19, %v805_v29  ;;  %v997_v33 = vld [vmem:[%s4184_s29] sm:$0x3]  ;;  %v4185_v22 = vld [vmem:[#allocation26_spill] sm:$0xff]  ;;  %s2439_s29 = scalar_lea.vmem %s3953_s23, 2048 }
 0x11e   : > { %v3479_v37 = vadd.f32 %v3273_v40, %v946_v21  ;;  %v4186_v28 = vsub.s32 0, %v4185_v22  ;;  %v4187_v26 = vsub.s32 1, %v4185_v22  ;;  %p2440_p7 = scmp.ne.s32.totalorder %s3953_s23, %s2439_s29 }
 0x11f   : > { %v3482_v0 = vadd.f32 %v3273_v40, %v947_v14 }
 0x120   : > { %4178 = vst [vmem:[#allocation30_spill] sm:$0xff] %v3479_v37  ;;  %v582_v54 = vld [vmem:[#allocation2 + $0xd8] sm:$0xff]  ;;  %v583_v53 = vld [vmem:[#allocation2 + $0xe0] sm:$0xff]  ;;  %v3554_v15 = vrot.slane %v997_v33, %v4186_v28  ;;  %v3558_v20 = vrot.slane %v997_v33, %v4187_v26  ;;  %p2441_p4 = pnand %p2440_p7, %p4198_p6 }
 0x121   : > { %4179 = vst [vmem:[#allocation31_spill] sm:$0xff] %v3482_v0  ;;  %v979_v41 = vpack.c.bf16 %v3482_v0, %v3479_v37  ;;  %v622_v16 = vld [vmem:[#allocation2 + $0xda] sm:$0xff]  ;;  %v623_v10 = vld [vmem:[#allocation2 + $0xe2] sm:$0xff]  ;;  %v860_v45 = vmul.f32 %v3116_v46, %v582_v54  ;;  %v861_v47 = vmul.f32 %v3116_v46, %v583_v53 }
 0x122   : > { %v932_v23 = vmul.f32 %v3254_v8, %v622_v16  ;;  %v933_v61 = vmul.f32 %v3254_v8, %v623_v10  ;;  %v2269_v8 = vld [vmem:[%s4182_s30 + $0x40] sm:$0xff]   ;;  %p2442_p0 = pneg %p2441_p4 }
 0x123   : > { %v876_v17 = vadd.f32 %v860_v45, %v840_v57  ;;  %v877_v6 = vadd.f32 %v861_v47, %v841_v9  ;;  %2039 = vmatprep.subr.bf16.mxu1 %v2269_v8 }
 0x124   : > { %1182 = vmatmul.mubr.bf16.gmra.mrb[24].mxu0 %v979_v41 }
 0x125   : > { %1191 = vmatprep.mubr.bf16.mxu0 %v4168_v13  ;;  %v912_v3 = vadd.f32 %v896_v30, %v876_v17  ;;  %v913_v60 = vadd.f32 %v897_v48, %v877_v6  ;;  %v2270_v13 = vld [vmem:[%s4183_s3] sm:$0xff]  }
 0x126   : > { %2040 = vmatpush3.bf16.msra.mxu1 %v2270_v13 }
 0x127   : > { %v948_v2 = vadd.f32 %v932_v23, %v912_v3  ;;  %v949_v44 = vadd.f32 %v933_v61, %v913_v60  ;;  %2041 = vmatprep.subr.bf16.mxu1 %v2271_v35 }
 0x129   : > { %v3494_v24 = vadd.f32 %v3273_v40, %v948_v2  ;;  %v3497_v46 = vadd.f32 %v3273_v40, %v949_v44  ;;  %v2272_v40 = vld [vmem:[%s4183_s3 + $0x8] sm:$0xff]  }
 0x12a   : > { %2042 = vmatpush3.bf16.msra.mxu1 %v2272_v40 }
 0x12b   : > { %4180 = vst [vmem:[#allocation32_spill] sm:$0xff] %v3494_v24  ;;  %4181 = vst [vmem:[#allocation33_spill] sm:$0xff] %v3497_v46  ;;  %v980_v39 = vpack.c.bf16 %v3497_v46, %v3494_v24  ;;  %2043 = vmatprep.subr.bf16.mxu1 %v2273_v36 }
 0x12d   : > { %1192 = vmatmul.mubr.bf16.gmra.mrb[28].mxu0 %v980_v39 }
 0x12e   : > { %2044 = vmatpush3.bf16.msra.mxu1 %v2274_v18 }
 0x12f   : > { %2045 = vmatprep.subr.bf16.mxu1 %v2275_v32 }
 0x132   : > { %2046 = vmatpush3.bf16.msra.mxu1 %v2276_v25 }
 0x133   : > { %2047 = vmatprep.subr.bf16.mxu1 %v2277_v34 }
 0x136   : > { %2048 = vmatpush3.bf16.msra.mxu1 %v2278_v63 }
 0x137   : > { %2049 = vmatprep.subr.bf16.mxu1 %v2279_v38 }
 0x13a   : > { %2050 = vmatpush3.bf16.msra.mxu1 %v2280_v31 }
 0x13b   : > { %2051 = vmatprep.subr.bf16.mxu1 %v2281_v50 }
 0x13e   : > { %2052 = vmatpush3.bf16.msra.mxu1 %v2282_v5 }
 0x13f   : > { %2053 = vmatprep.subr.bf16.mxu1 %v2283_v56 }
 0x142   : > { %2054 = vmatpush3.bf16.msra.mxu1 %v2284_v49 }
 0x1c5   : > { %v1123_v51 = vpop.f32.mrb[0].mxu0 }
 0x1c6   : > { %v3561_v7 = vadd.f32 %v1123_v51, %v3554_v15  ;;  %v1125_v29 = vpop.f32.mrb[1].mxu0 }
 0x1c7   : > { %v3564_v19 = vadd.f32 %v1125_v29, %v3558_v20  ;;  %v1127_v21 = vpop.f32.mrb[2].mxu0 }
 0x1c8   : > { %v1202_v14 = vmul.f32 %v3561_v7, %v3561_v7  ;;  %v3569_v57 = vadd.f32 %v1127_v21, %v3554_v15  ;;  %v1129_v54 = vpop.f32.mrb[3].mxu0 }
 0x1c9   : > { %v1203_v9 = vmul.f32 %v3564_v19, %v3564_v19  ;;  %v3574_v41 = vadd.f32 %v1129_v54, %v3558_v20 }
 0x1ca   : > { %v1234_v53 = vmul.f32 %v1202_v14, %v3561_v7  ;;  %v1204_v16 = vmul.f32 %v3569_v57, %v3569_v57 }
 0x1cb   : > { %v1235_v10 = vmul.f32 %v1203_v9, %v3564_v19  ;;  %v1205_v45 = vmul.f32 %v3574_v41, %v3574_v41 }
 0x1cc   : > { %v1266_v30 = vmul.f32 0.044715, %v1234_v53  ;;  %v1236_v47 = vmul.f32 %v1204_v16, %v3569_v57 }
 0x1cd   : > { %v1267_v48 = vmul.f32 0.044715, %v1235_v10  ;;  %v1237_v17 = vmul.f32 %v1205_v45, %v3574_v41  ;;  %v1133_v23 = vpop.f32.mrb[4].mxu0 }
 0x1ce   : > { %v1298_v6 = vadd.f32 %v1266_v30, %v3561_v7  ;;  %v1268_v61 = vmul.f32 0.044715, %v1236_v47  ;;  %v3586_v3 = vadd.f32 %v1133_v23, %v3554_v15  ;;  %v1135_v60 = vpop.f32.mrb[5].mxu0 }
 0x1cf   : > { %v1269_v2 = vmul.f32 0.044715, %v1237_v17  ;;  %v3589_v44 = vadd.f32 %v1135_v60, %v3558_v20  ;;  %v1137_v39 = vpop.f32.mrb[6].mxu0  ;;  %v1299_v8 = vadd.f32 %v1267_v48, %v3564_v19 }
 0x1d0   : > { %v1330_v13 = vmul.f32 0.7978846, %v1298_v6  ;;  %v1300_v35 = vadd.f32 %v1268_v61, %v3569_v57  ;;  %v1206_v40 = vmul.f32 %v3586_v3, %v3586_v3  ;;  %v3596_v36 = vadd.f32 %v1137_v39, %v3554_v15  ;;  %v1139_v18 = vpop.f32.mrb[7].mxu0 }
 0x1d1   : > { %v1207_v32 = vmul.f32 %v3589_v44, %v3589_v44  ;;  %v3601_v25 = vadd.f32 %v1139_v18, %v3558_v20  ;;  %v1301_v34 = vadd.f32 %v1269_v2, %v3574_v41  ;;  %v1331_v63 = vmul.f32 0.7978846, %v1299_v8 }
 0x1d2   : > { %2285 = vtanh.f32 %v1330_v13  ;;  %v1332_v38 = vmul.f32 0.7978846, %v1300_v35  ;;  %v1238_v31 = vmul.f32 %v1206_v40, %v3586_v3  ;;  %v1208_v50 = vmul.f32 %v3596_v36, %v3596_v36 }
 0x1d3   : > { %v1239_v5 = vmul.f32 %v1207_v32, %v3589_v44  ;;  %v1209_v56 = vmul.f32 %v3601_v25, %v3601_v25  ;;  %v1333_v49 = vmul.f32 0.7978846, %v1301_v34  ;;  %2287 = vtanh.f32 %v1331_v63 }
 0x1d4   : > { %2289 = vtanh.f32 %v1332_v38  ;;  %v1270_v33 = vmul.f32 0.044715, %v1238_v31  ;;  %v1240_v22 = vmul.f32 %v1208_v50, %v3596_v36 }
 0x1d5   : > { %v1271_v28 = vmul.f32 0.044715, %v1239_v5  ;;  %v1241_v26 = vmul.f32 %v1209_v56, %v3601_v25  ;;  %v1143_v51 = vpop.f32.mrb[8].mxu0  ;;  %2291 = vtanh.f32 %v1333_v49 }
 0x1d6   : > { %v1302_v29 = vadd.f32 %v1270_v33, %v3586_v3  ;;  %v1272_v21 = vmul.f32 0.044715, %v1240_v22  ;;  %v3614_v14 = vadd.f32 %v1143_v51, %v3554_v15  ;;  %v1145_v54 = vpop.f32.mrb[9].mxu0 }
 0x1d7   : > { %v1303_v9 = vadd.f32 %v1271_v28, %v3589_v44  ;;  %v1273_v53 = vmul.f32 0.044715, %v1241_v26  ;;  %v3618_v16 = vadd.f32 %v1145_v54, %v3558_v20  ;;  %v1147_v10 = vpop.f32.mrb[10].mxu0 }
 0x1d8   : > { %v1334_v45 = vmul.f32 0.7978846, %v1302_v29  ;;  %v1304_v30 = vadd.f32 %v1272_v21, %v3596_v36  ;;  %v1210_v47 = vmul.f32 %v3614_v14, %v3614_v14  ;;  %v3624_v48 = vadd.f32 %v1147_v10, %v3554_v15  ;;  %v1149_v17 = vpop.f32.mrb[11].mxu0 }
 0x1d9   : > { %v1335_v23 = vmul.f32 0.7978846, %v1303_v9  ;;  %v1305_v6 = vadd.f32 %v1273_v53, %v3601_v25  ;;  %v1211_v61 = vmul.f32 %v3618_v16, %v3618_v16  ;;  %v3630_v60 = vadd.f32 %v1149_v17, %v3558_v20 }
 0x1da   : > { %2293 = vtanh.f32 %v1334_v45  ;;  %v1336_v2 = vmul.f32 0.7978846, %v1304_v30  ;;  %v1242_v39 = vmul.f32 %v1210_v47, %v3614_v14  ;;  %v1212_v8 = vmul.f32 %v3624_v48, %v3624_v48 }
 0x1db   : > { %2295 = vtanh.f32 %v1335_v23  ;;  %v1337_v13 = vmul.f32 0.7978846, %v1305_v6  ;;  %v1243_v35 = vmul.f32 %v1211_v61, %v3618_v16  ;;  %v1213_v40 = vmul.f32 %v3630_v60, %v3630_v60 }
 0x1dc   : > { %v2286_v18 = vpop.eup %2285  ;;  %2297 = vtanh.f32 %v1336_v2  ;;  %v1274_v32 = vmul.f32 0.044715, %v1242_v39  ;;  %v1244_v34 = vmul.f32 %v1212_v8, %v3624_v48 }
 0x1dd   : > { %v2288_v63 = vpop.eup %2287  ;;  %2299 = vtanh.f32 %v1337_v13  ;;  %v1275_v38 = vmul.f32 0.044715, %v1243_v35  ;;  %v1245_v31 = vmul.f32 %v1213_v40, %v3630_v60  ;;  %v1153_v50 = vpop.f32.mrb[12].mxu0  ;;  %v3640_v5 = vadd.f32 1.0, %v2286_v18 }
 0x1de   : > { %v2290_v56 = vpop.eup %2289  ;;  %v1306_v49 = vadd.f32 %v1274_v32, %v3614_v14  ;;  %v1276_v33 = vmul.f32 0.044715, %v1244_v34  ;;  %v3644_v22 = vadd.f32 %v1153_v50, %v3554_v15  ;;  %v1155_v28 = vpop.f32.mrb[13].mxu0  ;;  %v1395_v26 = vadd.f32 1.0, %v2288_v63 }
 0x1df   : > { %v1307_v51 = vadd.f32 %v1275_v38, %v3618_v16  ;;  %v1277_v29 = vmul.f32 0.044715, %v1245_v31  ;;  %v3648_v21 = vadd.f32 %v1155_v28, %v3558_v20  ;;  %v1157_v54 = vpop.f32.mrb[14].mxu0  ;;  %v3650_v9 = vadd.f32 1.0, %v2290_v56  ;;  %v2292_v17 = vpop.eup %2291 }
 0x1e0   : > { %v1338_v53 = vmul.f32 0.7978846, %v1306_v49  ;;  %v1308_v10 = vadd.f32 %v1276_v33, %v3624_v48  ;;  %v1214_v45 = vmul.f32 %v3644_v22, %v3644_v22  ;;  %v3656_v30 = vadd.f32 %v1157_v54, %v3554_v15  ;;  %v1159_v47 = vpop.f32.mrb[15].mxu0 }
 0x1e1   : > { %v1339_v23 = vmul.f32 0.7978846, %v1307_v51  ;;  %v1309_v6 = vadd.f32 %v1277_v29, %v3630_v60  ;;  %v1215_v61 = vmul.f32 %v3648_v21, %v3648_v21  ;;  %v3662_v2 = vadd.f32 %v1159_v47, %v3558_v20 }
 0x1e2   : > { %2301 = vtanh.f32 %v1338_v53  ;;  %v1340_v39 = vmul.f32 0.7978846, %v1308_v10  ;;  %v1246_v8 = vmul.f32 %v1214_v45, %v3644_v22  ;;  %v1216_v13 = vmul.f32 %v3656_v30, %v3656_v30 }
 0x1e3   : > { %2303 = vtanh.f32 %v1339_v23  ;;  %v1341_v35 = vmul.f32 0.7978846, %v1309_v6  ;;  %v1247_v40 = vmul.f32 %v1215_v61, %v3648_v21  ;;  %v1217_v18 = vmul.f32 %v3662_v2, %v3662_v2 }
 0x1e4   : > { %v3670_v32 = vpop.eup %2293  ;;  %2305 = vtanh.f32 %v1340_v39  ;;  %v1278_v34 = vmul.f32 0.044715, %v1246_v8  ;;  %v1248_v63 = vmul.f32 %v1216_v13, %v3656_v30  ;;  %v1397_v38 = vadd.f32 1.0, %v2292_v17 }
 0x1e5   : > { %v3673_v31 = vpop.eup %2295  ;;  %2307 = vtanh.f32 %v1341_v35  ;;  %v1279_v50 = vmul.f32 0.044715, %v1247_v40  ;;  %v1249_v56 = vmul.f32 %v1217_v18, %v3662_v2  ;;  %v1427_v33 = vmul.f32 0.5, %v1395_v26 }
 0x1e6   : > { %v1163_v49 = vpop.f32.mrb[16].mxu0  ;;  %v3676_v28 = vpop.eup %2297  ;;  %v1310_v51 = vadd.f32 %v1278_v34, %v3644_v22  ;;  %v1280_v29 = vmul.f32 0.044715, %v1248_v63  ;;  %v1429_v10 = vmul.f32 0.5, %v1397_v38 }
 0x1e7   : > { %v3680_v54 = vadd.f32 %v1163_v49, %v3554_v15  ;;  %v1165_v53 = vpop.f32.mrb[17].mxu0  ;;  %v3682_v45 = vpop.eup %2299  ;;  %v1311_v47 = vadd.f32 %v1279_v50, %v3648_v21  ;;  %v1281_v17 = vmul.f32 0.044715, %v1249_v56  ;;  %v1459_v26 = vmul.f32 %v1427_v33, %v3564_v19 }
 0x1e8   : > { %v3686_v23 = vadd.f32 %v1165_v53, %v3558_v20  ;;  %v1167_v6 = vpop.f32.mrb[18].mxu0  ;;  %v1342_v61 = vmul.f32 0.7978846, %v1310_v51  ;;  %v1312_v39 = vadd.f32 %v1280_v29, %v3656_v30 }
 0x1e9   : > { %v1218_v8 = vmul.f32 %v3680_v54, %v3680_v54  ;;  %v3693_v13 = vadd.f32 %v1167_v6, %v3554_v15  ;;  %v1169_v35 = vpop.f32.mrb[19].mxu0  ;;  %v1343_v40 = vmul.f32 0.7978846, %v1311_v47  ;;  %v1313_v18 = vadd.f32 %v1281_v17, %v3662_v2 }
 0x1ea   : > { %v1219_v34 = vmul.f32 %v3686_v23, %v3686_v23  ;;  %v3699_v63 = vadd.f32 %v1169_v35, %v3558_v20  ;;  %2309 = vtanh.f32 %v1342_v61  ;;  %v1344_v19 = vmul.f32 0.7978846, %v1312_v39 }
 0x1eb   : > { %v1250_v38 = vmul.f32 %v1218_v8, %v3680_v54  ;;  %v1220_v50 = vmul.f32 %v3693_v13, %v3693_v13  ;;  %2311 = vtanh.f32 %v1343_v40  ;;  %v1345_v56 = vmul.f32 0.7978846, %v1313_v18 }
 0x1ec   : > { %v1251_v49 = vmul.f32 %v1219_v34, %v3686_v23  ;;  %v1221_v33 = vmul.f32 %v3699_v63, %v3699_v63  ;;  %v3707_v51 = vpop.eup %2301  ;;  %2313 = vtanh.f32 %v1344_v19  ;;  %v1461_v47 = vmul.f32 %v1429_v10, %v3574_v41 }
 0x1ed   : > { %v1282_v29 = vmul.f32 0.044715, %v1250_v38  ;;  %v1252_v53 = vmul.f32 %v1220_v50, %v3693_v13  ;;  %v3711_v17 = vpop.eup %2303  ;;  %2315 = vtanh.f32 %v1345_v56  ;;  %v1426_v39 = vmul.f32 0.5, %v3640_v5 }
 0x1ee   : > { %v1283_v6 = vmul.f32 0.044715, %v1251_v49  ;;  %v1253_v61 = vmul.f32 %v1221_v33, %v3699_v63  ;;  %v3715_v8 = vpop.eup %2305  ;;  %v1491_v18 = vpack.c.bf16 %v1461_v47, %v1459_v26  ;;  %v1428_v34 = vmul.f32 0.5, %v3650_v9 }
 0x1ef   : > { %v1314_v35 = vadd.f32 %v1282_v29, %v3680_v54  ;;  %v1284_v40 = vmul.f32 0.044715, %v1252_v53  ;;  %v1173_v19 = vpop.f32.mrb[20].mxu0  ;;  %v3719_v38 = vpop.eup %2307  ;;  %v1458_v50 = vmul.f32 %v1426_v39, %v3561_v7 }
 0x1f0   : > { %v1315_v41 = vadd.f32 %v1283_v6, %v3686_v23  ;;  %v1285_v10 = vmul.f32 0.044715, %v1253_v61  ;;  %v3724_v56 = vadd.f32 %v1173_v19, %v3554_v15  ;;  %v1175_v5 = vpop.f32.mrb[21].mxu0  ;;  %1673 = vmatprep.mubr.bf16.mxu1 %v1491_v18  ;;  %v1460_v26 = vmul.f32 %v1428_v34, %v3569_v57 }
 0x1f1   : > { %v1346_v49 = vmul.f32 0.7978846, %v1314_v35  ;;  %v1316_v33 = vadd.f32 %v1284_v40, %v3693_v13  ;;  %v3729_v9 = vadd.f32 %v1175_v5, %v3558_v20  ;;  %v1177_v29 = vpop.f32.mrb[22].mxu0 }
 0x1f2   : > { %v1347_v53 = vmul.f32 0.7978846, %v1315_v41  ;;  %v1317_v47 = vadd.f32 %v1285_v10, %v3699_v63  ;;  %v1222_v7 = vmul.f32 %v3724_v56, %v3724_v56  ;;  %v3735_v6 = vadd.f32 %v1177_v29, %v3554_v15  ;;  %v1179_v61 = vpop.f32.mrb[23].mxu0 }
 0x1f3   : > { %2317 = vtanh.f32 %v1346_v49  ;;  %v1348_v39 = vmul.f32 0.7978846, %v1316_v33  ;;  %v1490_v35 = vpack.c.bf16 %v1460_v26, %v1458_v50  ;;  %v1223_v57 = vmul.f32 %v3729_v9, %v3729_v9 }
 0x1f4   : > { %2319 = vtanh.f32 %v1347_v53  ;;  %v1349_v40 = vmul.f32 0.7978846, %v1317_v47  ;;  %v1254_v18 = vmul.f32 %v1222_v7, %v3724_v56  ;;  %v1224_v34 = vmul.f32 %v3735_v6, %v3735_v6  ;;  %v3742_v19 = vpop.eup %2309 }
 0x1f5   : > { %2321 = vtanh.f32 %v1348_v39  ;;  %1674 = vmatmul.mubr.bf16.vlgmr.msra.gmra.mrb[0].mxu1 %v1490_v35  ;;  %v1255_v41 = vmul.f32 %v1223_v57, %v3729_v9  ;;  %v3746_v10 = vadd.f32 %v1179_v61, %v3558_v20  ;;  %v1399_v50 = vadd.f32 1.0, %v3673_v31  ;;  %v3749_v5 = vpop.eup %2311 }
 0x1f6   : > { %2323 = vtanh.f32 %v1349_v40  ;;  %v1286_v49 = vmul.f32 0.044715, %v1254_v18  ;;  %v1256_v33 = vmul.f32 %v1224_v34, %v3735_v6  ;;  %v1401_v26 = vadd.f32 1.0, %v3682_v45  ;;  %v3753_v29 = vpop.eup %2313 }
 0x1f7   : > { %v1287_v53 = vmul.f32 0.044715, %v1255_v41  ;;  %v1225_v47 = vmul.f32 %v3746_v10, %v3746_v10  ;;  %v1431_v7 = vmul.f32 0.5, %v1399_v50  ;;  %v1398_v61 = vadd.f32 1.0, %v3670_v32  ;;  %v1183_v39 = vpop.f32.mrb[24].mxu0  ;;  %v3758_v35 = vpop.eup %2315 }
 0x1f8   : > { %v1318_v31 = vadd.f32 %v1286_v49, %v3724_v56  ;;  %v1288_v57 = vmul.f32 0.044715, %v1256_v33  ;;  %v1433_v40 = vmul.f32 0.5, %v1401_v26  ;;  %v1400_v18 = vadd.f32 1.0, %v3676_v28  ;;  %v1185_v34 = vpop.f32.mrb[25].mxu0 }
 0x1f9   : > { %v1319_v45 = vadd.f32 %v1287_v53, %v3729_v9  ;;  %v1257_v41 = vmul.f32 %v1225_v47, %v3746_v10  ;;  %v1463_v46 = vmul.f32 %v1431_v7, %v3589_v44  ;;  %v1430_v24 = vmul.f32 0.5, %v1398_v61  ;;  %v1187_v50 = vpop.f32.mrb[26].mxu0 }
 0x1fa   : > { %v1350_v0 = vmul.f32 0.7978846, %v1318_v31  ;;  %v1320_v32 = vadd.f32 %v1288_v57, %v3735_v6  ;;  %v1465_v37 = vmul.f32 %v1433_v40, %v3601_v25  ;;  %v1432_v58 = vmul.f32 0.5, %v1400_v18  ;;  %v1189_v49 = vpop.f32.mrb[27].mxu0 }
 0x1fb   : > { %v1351_v33 = vmul.f32 0.7978846, %v1319_v45  ;;  %v1289_v26 = vmul.f32 0.044715, %v1257_v41  ;;  %v1462_v28 = vmul.f32 %v1430_v24, %v3586_v3  ;;  %v3769_v1 = vadd.f32 %v1183_v39, %v3554_v15 }
 0x1fc   : > { %2325 = vtanh.f32 %v1350_v0  ;;  %v1352_v53 = vmul.f32 0.7978846, %v1320_v32  ;;  %v1493_v47 = vpack.c.bf16 %v1465_v37, %v1463_v46  ;;  %v1464_v44 = vmul.f32 %v1432_v58, %v3596_v36 }
 0x1fd   : > { %v3772_v7 = vpop.eup %2317  ;;  %2327 = vtanh.f32 %v1351_v33  ;;  %v1321_v61 = vadd.f32 %v1289_v26, %v3746_v10  ;;  %v1226_v25 = vmul.f32 %v3769_v1, %v3769_v1  ;;  %v3778_v31 = vadd.f32 %v1185_v34, %v3558_v20 }
 0x1fe   : > { %v3780_v24 = vpop.eup %2319  ;;  %2329 = vtanh.f32 %v1352_v53  ;;  %1681 = vmatprep.mubr.bf16.mxu1 %v1493_v47  ;;  %v1492_v0 = vpack.c.bf16 %v1464_v44, %v1462_v28  ;;  %v3783_v37 = vadd.f32 %v1187_v50, %v3554_v15  ;;  %v3786_v58 = vadd.f32 %v1189_v49, %v3558_v20 }
 0x1ff   : > { %v3788_v46 = vpop.eup %2321  ;;  %v1353_v3 = vmul.f32 0.7978846, %v1321_v61  ;;  %v1258_v36 = vmul.f32 %v1226_v25, %v3769_v1  ;;  %v1227_v39 = vmul.f32 %v3778_v31, %v3778_v31  ;;  %v1403_v57 = vadd.f32 1.0, %v3711_v17 }
 0x200   : > { %v3794_v40 = vpop.eup %2323  ;;  %1682 = vmatmul.mubr.bf16.gmra.mrb[4].mxu1 %v1492_v0  ;;  %v1228_v18 = vmul.f32 %v3783_v37, %v3783_v37  ;;  %v1229_v34 = vmul.f32 %v3786_v58, %v3786_v58  ;;  %v1405_v45 = vadd.f32 1.0, %v3719_v38  ;;  %v1402_v41 = vadd.f32 1.0, %v3707_v51  ;;  %v1193_v33 = vpop.f32.mrb[28].mxu0 }
 0x201   : > { %2331 = vtanh.f32 %v1353_v3  ;;  %v1290_v50 = vmul.f32 0.044715, %v1258_v36  ;;  %v1259_v32 = vmul.f32 %v1227_v39, %v3778_v31  ;;  %v1435_v49 = vmul.f32 0.5, %v1403_v57  ;;  %v1195_v47 = vpop.f32.mrb[29].mxu0 }
 0x202   : > { %v1260_v17 = vmul.f32 %v1228_v18, %v3783_v37  ;;  %v1261_v26 = vmul.f32 %v1229_v34, %v3786_v58  ;;  %v1437_v28 = vmul.f32 0.5, %v1405_v45  ;;  %v1404_v53 = vadd.f32 1.0, %v3715_v8  ;;  %v1197_v25 = vpop.f32.mrb[30].mxu0 }
 0x203   : > { %v1322_v44 = vadd.f32 %v1290_v50, %v3769_v1  ;;  %v1291_v61 = vmul.f32 0.044715, %v1259_v32  ;;  %v1467_v38 = vmul.f32 %v1435_v49, %v3618_v16  ;;  %v1434_v51 = vmul.f32 0.5, %v1402_v41  ;;  %v1199_v57 = vpop.f32.mrb[31].mxu0 }
 0x204   : > { %v1292_v0 = vmul.f32 0.044715, %v1260_v17  ;;  %v1293_v3 = vmul.f32 0.044715, %v1261_v26  ;;  %v1469_v36 = vmul.f32 %v1437_v28, %v3630_v60  ;;  %v1436_v39 = vmul.f32 0.5, %v1404_v53 }
 0x205   : > { %v1354_v18 = vmul.f32 0.7978846, %v1322_v44  ;;  %v1323_v34 = vadd.f32 %v1291_v61, %v3778_v31  ;;  %v1466_v45 = vmul.f32 %v1434_v51, %v3614_v14  ;;  %v3812_v8 = vadd.f32 %v1193_v33, %v3554_v15 }
 0x206   : > { %v3814_v50 = vpop.eup %2325  ;;  %v1324_v16 = vadd.f32 %v1292_v0, %v3783_v37  ;;  %v1325_v41 = vadd.f32 %v1293_v3, %v3786_v58  ;;  %v1495_v32 = vpack.c.bf16 %v1469_v36, %v1467_v38  ;;  %v1468_v49 = vmul.f32 %v1436_v39, %v3624_v48 }
 0x207   : > { %v3819_v60 = vpop.eup %2327  ;;  %2333 = vtanh.f32 %v1354_v18  ;;  %v1355_v17 = vmul.f32 0.7978846, %v1323_v34  ;;  %v1230_v26 = vmul.f32 %v3812_v8, %v3812_v8  ;;  %v3824_v14 = vadd.f32 %v1195_v47, %v3558_v20 }
 0x208   : > { %v3826_v33 = vpop.eup %2329  ;;  %v1356_v28 = vmul.f32 0.7978846, %v1324_v16  ;;  %v1357_v53 = vmul.f32 0.7978846, %v1325_v41  ;;  %1689 = vmatprep.mubr.bf16.mxu1 %v1495_v32  ;;  %v1494_v44 = vpack.c.bf16 %v1468_v49, %v1466_v45  ;;  %v3829_v61 = vadd.f32 %v1197_v25, %v3554_v15 }
 0x209   : > { %2335 = vtanh.f32 %v1355_v17  ;;  %v1262_v48 = vmul.f32 %v1230_v26, %v3812_v8  ;;  %v1231_v38 = vmul.f32 %v3824_v14, %v3824_v14  ;;  %v3835_v51 = vadd.f32 %v1199_v57, %v3558_v20 }
 0x20a   : > { %2337 = vtanh.f32 %v1356_v28  ;;  %1690 = vmatmul.mubr.bf16.gmra.mrb[8].mxu1 %v1494_v44  ;;  %v1232_v47 = vmul.f32 %v3829_v61, %v3829_v61  ;;  %v1407_v0 = vadd.f32 1.0, %v3749_v5  ;;  %v1409_v3 = vadd.f32 1.0, %v3758_v35 }
 0x20b   : > { %v2332_v15 = vpop.eup %2331  ;;  %2339 = vtanh.f32 %v1357_v53  ;;  %v1294_v25 = vmul.f32 0.044715, %v1262_v48  ;;  %v1263_v36 = vmul.f32 %v1231_v38, %v3824_v14  ;;  %v1233_v39 = vmul.f32 %v3835_v51, %v3835_v51 }
 0x20c   : > { %v1264_v20 = vmul.f32 %v1232_v47, %v3829_v61  ;;  %v1439_v57 = vmul.f32 0.5, %v1407_v0  ;;  %v1441_v18 = vmul.f32 0.5, %v1409_v3  ;;  %v1406_v34 = vadd.f32 1.0, %v3742_v19 }
 0x20d   : > { %v1326_v45 = vadd.f32 %v1294_v25, %v3812_v8  ;;  %v1295_v16 = vmul.f32 0.044715, %v1263_v36  ;;  %v1265_v5 = vmul.f32 %v1233_v39, %v3835_v51  ;;  %v1408_v35 = vadd.f32 1.0, %v3753_v29 }
 0x20e   : > { %v1296_v41 = vmul.f32 0.044715, %v1264_v20  ;;  %v1471_v32 = vmul.f32 %v1439_v57, %v3648_v21  ;;  %v1473_v49 = vmul.f32 %v1441_v18, %v3662_v2  ;;  %v1438_v17 = vmul.f32 0.5, %v1406_v34 }
 0x20f   : > { %v1358_v26 = vmul.f32 0.7978846, %v1326_v45  ;;  %v1327_v28 = vadd.f32 %v1295_v16, %v3824_v14  ;;  %v1297_v53 = vmul.f32 0.044715, %v1265_v5  ;;  %v1440_v44 = vmul.f32 0.5, %v1408_v35 }
 0x210   : > { %v1328_v19 = vadd.f32 %v1296_v41, %v3829_v61  ;;  %v1497_v48 = vpack.c.bf16 %v1473_v49, %v1471_v32  ;;  %v1470_v38 = vmul.f32 %v1438_v17, %v3644_v22  ;;  %v1411_v47 = vadd.f32 1.0, %v3780_v24 }
 0x211   : > { %v2334_v0 = vpop.eup %2333  ;;  %2341 = vtanh.f32 %v1358_v26  ;;  %v1359_v29 = vmul.f32 0.7978846, %v1327_v28  ;;  %v1329_v21 = vadd.f32 %v1297_v53, %v3835_v51  ;;  %v1472_v2 = vmul.f32 %v1440_v44, %v3656_v30 }
 0x212   : > { %v1360_v3 = vmul.f32 0.7978846, %v1328_v19  ;;  %1697 = vmatprep.mubr.bf16.mxu1 %v1497_v48  ;;  %v1413_v25 = vadd.f32 1.0, %v3794_v40  ;;  %v1443_v36 = vmul.f32 0.5, %v1411_v47  ;;  %v1410_v39 = vadd.f32 1.0, %v3772_v7 }
 0x213   : > { %v2336_v20 = vpop.eup %2335  ;;  %2343 = vtanh.f32 %v1359_v29  ;;  %v1361_v57 = vmul.f32 0.7978846, %v1329_v21  ;;  %v1496_v22 = vpack.c.bf16 %v1472_v2, %v1470_v38  ;;  %v1412_v24 = vadd.f32 1.0, %v3788_v46 }
 0x214   : > { %v2338_v18 = vpop.eup %2337  ;;  %2345 = vtanh.f32 %v1360_v3  ;;  %v1445_v34 = vmul.f32 0.5, %v1413_v25  ;;  %v1475_v45 = vmul.f32 %v1443_v36, %v3686_v23  ;;  %v1442_v16 = vmul.f32 0.5, %v1410_v39 }
 0x215   : > { %v2340_v30 = vpop.eup %2339  ;;  %2347 = vtanh.f32 %v1361_v57  ;;  %1698 = vmatmul.mubr.bf16.gmra.mrb[12].mxu1 %v1496_v22  ;;  %v1444_v5 = vmul.f32 0.5, %v1412_v24  ;;  %v1415_v40 = vadd.f32 1.0, %v3819_v60  ;;  %v1417_v35 = vadd.f32 1.0, %v2332_v15 }
 0x216   : > { %v1477_v7 = vmul.f32 %v1445_v34, %v3699_v63  ;;  %v1474_v41 = vmul.f32 %v1442_v16, %v3680_v54  ;;  %v1414_v32 = vadd.f32 1.0, %v3814_v50  ;;  %v1416_v46 = vadd.f32 1.0, %v3826_v33 }
 0x217   : > { %v1476_v49 = vmul.f32 %v1444_v5, %v3693_v13  ;;  %v1447_v17 = vmul.f32 0.5, %v1415_v40  ;;  %v1449_v23 = vmul.f32 0.5, %v1417_v35  ;;  %v1419_v26 = vadd.f32 1.0, %v2336_v20  ;;  %v1738_v35 = vld [vmem:[%s3002_s25] sm:$0xff] }
 0x218   : > { %v1499_v28 = vpack.c.bf16 %v1477_v7, %v1475_v45  ;;  %v1446_v53 = vmul.f32 0.5, %v1414_v32  ;;  %v1448_v44 = vmul.f32 0.5, %v1416_v46  ;;  %v1421_v19 = vadd.f32 1.0, %v2340_v30 }
 0x219   : > { %v1498_v48 = vpack.c.bf16 %v1476_v49, %v1474_v41  ;;  %v1479_v60 = vmul.f32 %v1447_v17, %v3729_v9  ;;  %v1481_v63 = vmul.f32 %v1449_v23, %v3746_v10  ;;  %v1451_v15 = vmul.f32 0.5, %v1419_v26 }
 0x21a   : > { %1705 = vmatprep.mubr.bf16.mxu1 %v1499_v28  ;;  %v1478_v54 = vmul.f32 %v1446_v53, %v3724_v56  ;;  %v1480_v50 = vmul.f32 %v1448_v44, %v3735_v6  ;;  %v1453_v33 = vmul.f32 0.5, %v1421_v19  ;;  %v1418_v13 = vadd.f32 1.0, %v2334_v0 }
 0x21b   : > { %v2342_v38 = vpop.eup %2341  ;;  %v1501_v47 = vpack.c.bf16 %v1481_v63, %v1479_v60  ;;  %v1483_v29 = vmul.f32 %v1451_v15, %v3778_v31  ;;  %v1420_v21 = vadd.f32 1.0, %v2338_v18 }
 0x21c   : > { %v1500_v2 = vpack.c.bf16 %v1480_v50, %v1478_v54  ;;  %v1485_v3 = vmul.f32 %v1453_v33, %v3786_v58  ;;  %v1450_v25 = vmul.f32 0.5, %v1418_v13  ;;  %v1422_v9 = vadd.f32 1.0, %v2342_v38 }
 0x21d   : > { %v2344_v36 = vpop.eup %2343  ;;  %1706 = vmatmul.mubr.bf16.gmra.mrb[16].mxu1 %v1498_v48  ;;  %v1452_v10 = vmul.f32 0.5, %v1420_v21  ;;  %v1741_v48 = vld [vmem:[%s3002_s25 + $0x18] sm:$0xff] }
 0x21e   : > { %v2346_v39 = vpop.eup %2345  ;;  %1713 = vmatprep.mubr.bf16.mxu1 %v1501_v47  ;;  %v1503_v56 = vpack.c.bf16 %v1485_v3, %v1483_v29  ;;  %v1423_v20 = vadd.f32 1.0, %v2344_v36  ;;  %v1482_v0 = vmul.f32 %v1450_v25, %v3769_v1  ;;  %v1454_v31 = vmul.f32 0.5, %v1422_v9  ;;  %v1742_v29 = vld [vmem:[%s3002_s25 + $0x20] sm:$0xff] }
 0x21f   : > { %v2348_v6 = vpop.eup %2347  ;;  %v1484_v57 = vmul.f32 %v1452_v10, %v3783_v37  ;;  %v1424_v22 = vadd.f32 1.0, %v2346_v39  ;;  %v1757_v33 = vadd.f32 %v1741_v48, %v3325_v11  ;;  %v1758_v25 = vadd.f32 %v1742_v29, %v3353_v55  ;;  %v1745_v55 = vld [vmem:[%s3002_s25 + $0x38] sm:$0xff]  ;;  %v4192_v29 = vld [vmem:[#allocation30_spill] sm:$0xff] }
 0x220   : > { %v1425_v24 = vadd.f32 1.0, %v2348_v6  ;;  %v1455_v18 = vmul.f32 0.5, %v1423_v20  ;;  %v1486_v16 = vmul.f32 %v1454_v31, %v3812_v8  ;;  %v3883_v8 = vld [vmem:[%s4188_s21] ss:$0 sm:$0xff]  ;;  %s2445_s21 = scalar_lea.vmem %s2444_s12, 4096 }
 0x221   : > { %v1502_v58 = vpack.c.bf16 %v1484_v57, %v1482_v0  ;;  %v1456_v34 = vmul.f32 0.5, %v1424_v22  ;;  %v1744_v0 = vld [vmem:[%s3002_s25 + $0x30] sm:$0xff]  ;;  %p2447_p11 = scmp.lt.s32.totalorder %s2445_s21, %s2439_s29 }
 0x222   : > { %v1457_v45 = vmul.f32 0.5, %v1425_v24  ;;  %v1487_v5 = vmul.f32 %v1455_v18, %v3824_v14  ;;  %v1739_v14 = vld [vmem:[%s3002_s25 + $0x8] sm:$0xff]  ;;  %v1760_v24 = vadd.f32 %v1744_v0, %v3390_v62  ;;  %v1753_v0 = vld [vmem:[%s3002_s25 + $0x78] sm:$0xff] }
 0x223   : > { %v1488_v30 = vmul.f32 %v1456_v34, %v3829_v61  ;;  %v1755_v23 = vadd.f32 %v1739_v14, %v3296_v43  ;;  %p2448_p2 = por %p2447_p11, %p2446_p12 }
 0x224   : > { %v1489_v40 = vmul.f32 %v1457_v45, %v3835_v51  ;;  %v1754_v51 = vadd.f32 %v1738_v35, %v3292_v4  ;;  %v1740_v4 = vld [vmem:[%s3002_s25 + $0x10] sm:$0xff]  ;;  %v1761_v45 = vadd.f32 %v1745_v55, %v3393_v59  ;;  %v1747_v35 = vld [vmem:[%s3002_s25 + $0x48] sm:$0xff] }
 0x225   : > { %1714 = vmatmul.mubr.bf16.gmra.mrb[20].mxu1 %v1500_v2  ;;  %v1504_v1 = vpack.c.bf16 %v1488_v30, %v1486_v16  ;;  %v1756_v60 = vadd.f32 %v1740_v4, %v3322_v12  ;;  %v1743_v12 = vld [vmem:[%s3002_s25 + $0x28] sm:$0xff]  ;;  %p2449_p1 = pnand %p2448_p2, %p2442_p0 }
 0x226   : > { %1721 = vmatprep.mubr.bf16.mxu1 %v1503_v56  ;;  %v1505_v37 = vpack.c.bf16 %v1489_v40, %v1487_v5  ;;  %v1759_v39 = vadd.f32 %v1743_v12, %v3356_v27  ;;  %v1746_v5 = vld [vmem:[%s3002_s25 + $0x40] sm:$0xff] }
 0x22d   : > { %1722 = vmatmul.mubr.bf16.gmra.mrb[24].mxu1 %v1502_v58 }
 0x22e   : > { %1729 = vmatprep.mubr.bf16.mxu1 %v1505_v37 }
 0x235   : > { %1730 = vmatmul.mubr.bf16.gmra.mrb[28].mxu1 %v1504_v1 }
 0x2c8   : > { %v2055_v7 = vpop.f32.mrb[0].mxu1 }
 0x2c9   : > { %v2056_v61 = vpop.f32.mrb[1].mxu1 }
 0x2ca   : > { %v2057_v41 = vadd.f32 %v2056_v61, %v2055_v7  ;;  %v2058_v32 = vpop.f32.mrb[2].mxu1  ;;  %v1762_v7 = vadd.f32 %v1746_v5, %v3426_v52 }
 0x2cb   : > { %v2059_v46 = vpop.f32.mrb[3].mxu1 }
 0x2cc   : > { %v1676_v49 = vadd.f32 %v2057_v41, %v3883_v8  ;;  %v2060_v17 = vadd.f32 %v2059_v46, %v2058_v32 }
 0x2ce   : > { %v1770_v26 = vadd.f32 %v1754_v51, %v1676_v49  ;;  %v1679_v28 = vadd.f32 %v2060_v17, %v3883_v8  ;;  %v1763_v51 = vadd.f32 %v1747_v35, %v3429_v42  ;;  %v1748_v49 = vld [vmem:[%s3002_s25 + $0x50] sm:$0xff] }
 0x2d0   : > { %1786 = vst [vmem:[%s3892_s18] sm:$0xff] %v1770_v26  ;;  %v1771_v53 = vadd.f32 %v1755_v23, %v1679_v28  ;;  %v1749_v28 = vld [vmem:[%s3002_s25 + $0x58] sm:$0xff] }
 0x2d2   : > { %1787 = vst [vmem:[%s3892_s18 + $0x8] sm:$0xff] %v1771_v53  ;;  %v4189_v53 = vld [vmem:[#allocation28_spill] sm:$0xff] }
 0x2d3   : > { %v2061_v44 = vpop.f32.mrb[4].mxu1  ;;  %v1764_v4 = vadd.f32 %v1748_v49, %v4189_v53 }
 0x2d4   : > { %v2062_v19 = vpop.f32.mrb[5].mxu1 }
 0x2d5   : > { %v2063_v43 = vadd.f32 %v2062_v19, %v2061_v44  ;;  %v2064_v63 = vpop.f32.mrb[6].mxu1 }
 0x2d6   : > { %v2065_v15 = vpop.f32.mrb[7].mxu1 }
 0x2d7   : > { %v1684_v54 = vadd.f32 %v2063_v43, %v3883_v8  ;;  %v2066_v50 = vadd.f32 %v2065_v15, %v2064_v63  ;;  %v4190_v43 = vld [vmem:[#allocation29_spill] sm:$0xff] }
 0x2d9   : > { %v1772_v13 = vadd.f32 %v1756_v60, %v1684_v54  ;;  %v1687_v38 = vadd.f32 %v2066_v50, %v3883_v8  ;;  %v1765_v60 = vadd.f32 %v1749_v28, %v4190_v43  ;;  %v1750_v54 = vld [vmem:[%s3002_s25 + $0x60] sm:$0xff] }
 0x2db   : > { %1788 = vst [vmem:[%s3892_s18 + $0x10] sm:$0xff] %v1772_v13  ;;  %v1773_v47 = vadd.f32 %v1757_v33, %v1687_v38  ;;  %v1751_v38 = vld [vmem:[%s3002_s25 + $0x68] sm:$0xff] }
 0x2dd   : > { %1789 = vst [vmem:[%s3892_s18 + $0x18] sm:$0xff] %v1773_v47  ;;  %v2067_v21 = vpop.f32.mrb[8].mxu1 }
 0x2de   : > { %v2068_v2 = vpop.f32.mrb[9].mxu1 }
 0x2df   : > { %v2069_v3 = vadd.f32 %v2068_v2, %v2067_v21  ;;  %v2070_v9 = vpop.f32.mrb[10].mxu1  ;;  %v1766_v21 = vadd.f32 %v1750_v54, %v4192_v29 }
 0x2e0   : > { %v2071_v36 = vpop.f32.mrb[11].mxu1 }
 0x2e1   : > { %v1692_v11 = vadd.f32 %v2069_v3, %v3883_v8  ;;  %v2072_v10 = vadd.f32 %v2071_v36, %v2070_v9  ;;  %v4193_v9 = vld [vmem:[#allocation31_spill] sm:$0xff] }
 0x2e2   : > { %v1767_v36 = vadd.f32 %v1751_v38, %v4193_v9 }
 0x2e3   : > { %v1774_v56 = vadd.f32 %v1758_v25, %v1692_v11  ;;  %v1695_v20 = vadd.f32 %v2072_v10, %v3883_v8 }
 0x2e5   : > { %1790 = vst [vmem:[%s3892_s18 + $0x20] sm:$0xff] %v1774_v56  ;;  %v1775_v6 = vadd.f32 %v1759_v39, %v1695_v20  ;;  %v1752_v39 = vld [vmem:[%s3002_s25 + $0x70] sm:$0xff] }
 0x2e7   : > { %1791 = vst [vmem:[%s3892_s18 + $0x28] sm:$0xff] %v1775_v6 }
 0x2e8   : > { %v2073_v57 = vpop.f32.mrb[12].mxu1 }
 0x2e9   : > { %v2074_v22 = vpop.f32.mrb[13].mxu1 }
 0x2ea   : > { %v2075_v31 = vadd.f32 %v2074_v22, %v2073_v57  ;;  %v2076_v18 = vpop.f32.mrb[14].mxu1  ;;  %v4194_v22 = vld [vmem:[#allocation32_spill] sm:$0xff] }
 0x2eb   : > { %v2077_v58 = vpop.f32.mrb[15].mxu1  ;;  %v1768_v55 = vadd.f32 %v1752_v39, %v4194_v22 }
 0x2ec   : > { %v1700_v27 = vadd.f32 %v2075_v31, %v3883_v8  ;;  %v2078_v34 = vadd.f32 %v2077_v58, %v2076_v18 }
 0x2ee   : > { %v1776_v16 = vadd.f32 %v1760_v24, %v1700_v27  ;;  %v1703_v30 = vadd.f32 %v2078_v34, %v3883_v8  ;;  %v4195_v27 = vld [vmem:[#allocation33_spill] sm:$0xff] }
 0x2ef   : > { %v1769_v34 = vadd.f32 %v1753_v0, %v4195_v27 }
 0x2f0   : > { %1792 = vst [vmem:[%s3892_s18 + $0x30] sm:$0xff] %v1776_v16  ;;  %v1777_v40 = vadd.f32 %v1761_v45, %v1703_v30  ;;  %v2079_v1 = vpop.f32.mrb[16].mxu1 }
 0x2f1   : > { %v2080_v37 = vpop.f32.mrb[17].mxu1 }
 0x2f2   : > { %1793 = vst [vmem:[%s3892_s18 + $0x38] sm:$0xff] %v1777_v40  ;;  %v2081_v62 = vadd.f32 %v2080_v37, %v2079_v1  ;;  %v2082_v61 = vpop.f32.mrb[18].mxu1 }
 0x2f3   : > { %v2083_v14 = vpop.f32.mrb[19].mxu1 }
 0x2f4   : > { %v1708_v59 = vadd.f32 %v2081_v62, %v3883_v8  ;;  %v2084_v41 = vadd.f32 %v2083_v14, %v2082_v61 }
 0x2f6   : > { %v1778_v32 = vadd.f32 %v1762_v7, %v1708_v59  ;;  %v1711_v46 = vadd.f32 %v2084_v41, %v3883_v8 }
 0x2f8   : > { %1794 = vst [vmem:[%s3892_s18 + $0x40] sm:$0xff] %v1778_v32  ;;  %v1779_v17 = vadd.f32 %v1763_v51, %v1711_v46  ;;  %v2085_v23 = vpop.f32.mrb[20].mxu1 }
 0x2f9   : > { %v2086_v26 = vpop.f32.mrb[21].mxu1 }
 0x2fa   : > { %1795 = vst [vmem:[%s3892_s18 + $0x48] sm:$0xff] %v1779_v17  ;;  %v2087_v52 = vadd.f32 %v2086_v26, %v2085_v23  ;;  %v2088_v44 = vpop.f32.mrb[22].mxu1 }
 0x2fb   : > { %v2089_v19 = vpop.f32.mrb[23].mxu1 }
 0x2fc   : > { %v1716_v42 = vadd.f32 %v2087_v52, %v3883_v8  ;;  %v2090_v48 = vadd.f32 %v2089_v19, %v2088_v44 }
 0x2fe   : > { %v1780_v63 = vadd.f32 %v1764_v4, %v1716_v42  ;;  %v1719_v15 = vadd.f32 %v2090_v48, %v3883_v8 }
 0x300   : > { %1796 = vst [vmem:[%s3892_s18 + $0x50] sm:$0xff] %v1780_v63  ;;  %v1781_v50 = vadd.f32 %v1765_v60, %v1719_v15  ;;  %v2091_v33 = vpop.f32.mrb[24].mxu1 }
 0x301   : > { %v2092_v13 = vpop.f32.mrb[25].mxu1 }
 0x302   : > { %1797 = vst [vmem:[%s3892_s18 + $0x58] sm:$0xff] %v1781_v50  ;;  %v2093_v47 = vadd.f32 %v2092_v13, %v2091_v33  ;;  %v2094_v2 = vpop.f32.mrb[26].mxu1 }
 0x303   : > { %v2095_v12 = vpop.f32.mrb[27].mxu1 }
 0x304   : > { %v1724_v3 = vadd.f32 %v2093_v47, %v3883_v8  ;;  %v2096_v25 = vadd.f32 %v2095_v12, %v2094_v2 }
 0x306   : > { %v1782_v11 = vadd.f32 %v1766_v21, %v1724_v3  ;;  %v1727_v10 = vadd.f32 %v2096_v25, %v3883_v8 }
 0x308   : > { %1798 = vst [vmem:[%s3892_s18 + $0x60] sm:$0xff] %v1782_v11  ;;  %v1783_v56 = vadd.f32 %v1767_v36, %v1727_v10  ;;  %v2097_v20 = vpop.f32.mrb[28].mxu1 }
 0x309   : > { %v2098_v6 = vpop.f32.mrb[29].mxu1 }
 0x30a   : > { %1799 = vst [vmem:[%s3892_s18 + $0x68] sm:$0xff] %v1783_v56  ;;  %v2099_v57 = vadd.f32 %v2098_v6, %v2097_v20  ;;  %v2100_v31 = vpop.f32.mrb[30].mxu1 }
 0x30b   : > { %v2101_v24 = vpop.f32.mrb[31].mxu1 }
 0x30c   : > { %v1732_v18 = vadd.f32 %v2099_v57, %v3883_v8  ;;  %v2102_v58 = vadd.f32 %v2101_v24, %v2100_v31 }
 0x30e   : > { %v1784_v45 = vadd.f32 %v1768_v55, %v1732_v18  ;;  %v1735_v16 = vadd.f32 %v2102_v58, %v3883_v8 }
 0x310   : > { %1800 = vst [vmem:[%s3892_s18 + $0x70] sm:$0xff] %v1784_v45  ;;  %v1785_v30 = vadd.f32 %v1769_v34, %v1735_v16 }
 0x312   : > { %1801 = vst [vmem:[%s3892_s18 + $0x78] sm:$0xff] %v1785_v30 }
 0x313   : > { %2452 = shalt.err (!%p2449_p1)
}
 0x314   : > { %s2453_s18 = scalar_lea.hbm %s3959_s13, 2048  ;;  %s2457_s17 = scalar_lea.hbm %s4197_s9, 8192 }
 0x315   : > { %p2454_p5 = scmp.ne.s32.totalorder %s3959_s13, %s2453_s18  ;;  %p2458_p10 = scmp.lt.u32.totalorder %s3959_s13, %s4197_s9 }
 0x316   : > { %p2459_p3 = scmp.lt.u32.totalorder %s2457_s17, %s2453_s18  ;;  %p2461_p7 = scmp.lt.u32.totalorder %s2453_s18, %s3959_s13 }
 0x317   : > { %p2455_p8 = pnand %p2454_p5, %p4198_p6 }
 0x318   : > { %p2460_p9 = por %p2459_p3, %p2458_p10 }
 0x319   : > { %p2456_p13 = pneg %p2455_p8 }
 0x31a   : > { %p2462_p4 = por %p2461_p7, %p2460_p9 }
 0x31c   : > { %p2463_p0 = pnand %p2462_p4, %p2456_p13 }
 0x31e   : > { %2466 = shalt.err (!%p2463_p0)
}
 0x31f   : > { %s2603_s25 = smov 128   ;;  %s2604_s30 = smov 8  }
 0x320   : > { %2109 = dma.vmem_to_hbm [thread:$0]  (%p4198_p6), %s3953_s23, 2048, %s3959_s13, %s1803_s4, %s2603_s25, %s2603_s25, %s2604_s30  }
 0x321 PF: > { %p2126_p12 = scmp.ge.s32.totalorder %s2593_s22, 2  ;;  %s1834_s19 = sand.u32 1, %s2565_s15  }
 0x322   : > { %p4199_p11 = scmp.ne.s32.totalorder %s4134_s27, 0  ;;  %s1835_s29 = scalar_lea.sflag [#allocation5], %s1834_s19 }
 0x324   : > { %p2122_p2 = pnand %p2126_p12, %p4199_p11 }
 0x326   : > { %2536 = dma.done.wait (!%p2122_p2), %s1835_s29, 2048  }
 0x327   : > { %2538 = vsyncadd (!%p2122_p2), %s1835_s29, 4294965248  ;;  %s28_s22 = sadd.s32 1, %s2593_s22   ;;  %s4201_s12 = sld [smem:[#allocation14_spill]] }
 0x328   : > { %p3991_p1 = scmp.ge.s32.totalorder %s28_s22, 6   ;;  %s4202_s8 = sld [smem:[#allocation24_spill]] }
 0x329   : > { %s4203_s7 = sld [smem:[#allocation15_spill]]  ;;  %s4204_s17 = sld [smem:[#allocation25_spill]] }
 0x32a   : > { %s4205_s18 = sld [smem:[#allocation18_spill]]  ;;  %s4206_s19 = sld [smem:[#allocation19_spill]] }
 0x32b   : > { %s4207_s20 = sld [smem:[#allocation20_spill]]  ;;  %s4208_s21 = sld [smem:[#allocation21_spill]] }
 0x32c   : > { %s4209_s30 = smov %s2545_s10  ;;  %s4210_s10 = smov %s2549_s11 }
 0x32d   : > { %s4211_s11 = smov %s2946_s1  ;;  %s4212_s13 = smov %s2561_s14 }
 0x32e   : > { %s4213_s14 = smov %s4202_s8  ;;  %s4214_s15 = smov %s2569_s16 }
 0x32f   : > { %s4215_s16 = smov %s4203_s7  ;;  %27 = sbr.rel (!%p3991_p1) target bundleno = 23 (0x17), region = 127 }
 0x336   :  { %1840 = vsyncpa [#allocation4], 1 }
 0x337   :  { %1842 = vsyncpa [#allocation4 + $0x1], 1 }
 0x338   :  { %1843 = vsyncpa [#allocation7], 1 }
 0x339   :  { %1845 = vsyncpa [#allocation7 + $0x1], 1 }
 0x33a   :  { %1846 = vsyncpa [#allocation5], 1 }
 0x33b   :  { %1848 = vsyncpa [#allocation5 + $0x1], 1 }

</bundles_post_ra>
